<compile_context>
chip_gen: v6e
topology: v6e:2x2x1
jax: 0.10.0
libtpu: 0.0.40
codegen_flags: <defaults>
</compile_context>

<pallas_src>
import math

import jax
import jax.numpy as jnp
from jax.experimental import pallas as pl
from jax.experimental.pallas import tpu as pltpu


def _round_up(x, m):
    return ((x + m - 1) // m) * m


def _pad2d(a, rows, cols, dtype=None):
    """Optional dtype cast fused with zero-padding (one pass over the data)."""
    if dtype is not None and a.dtype != dtype:
        a = a.astype(dtype)
    r, c = a.shape
    if r == rows and c == cols:
        return a
    return jnp.pad(a, ((0, rows - r), (0, cols - c)))


# ---------------------------------------------------------------------------
# Fused LINKX forward kernel.
# grid = (n_p//tm, n_p//tk):  i = node-row tile, k = reduction tile over A cols.
# ---------------------------------------------------------------------------
def _linkx_kernel(a_ref, we_ref, be_ref, x_ref, wx_ref, bx_ref,
                  wc1_ref, bc1_ref, wc2_ref, bc2_ref, wf_ref, bf_ref,
                  o_ref, acc_ref):
    k = pl.program_id(1)

    @pl.when(k == 0)
    def _():
        acc_ref[...] = jnp.zeros_like(acc_ref)

    # Dominant GEMM: A_tile @ W_edge_tile.  Both operands already arrive as
    # bf16 from HBM (A is 0/1 -> lossless); f32 accumulation on the MXU.
    acc_ref[...] += jnp.dot(a_ref[...], we_ref[...],
                            preferred_element_type=jnp.float32)

    # Epilogue (rest of LINKX) once per row tile, on the last reduction step.
    @pl.when(k == pl.num_programs(1) - 1)
    def _():
        h_a = acc_ref[...] + be_ref[...]                       # f32
        out = h_a + bc1_ref[...] + jnp.dot(
            h_a.astype(jnp.bfloat16), wc1_ref[...],
            preferred_element_type=jnp.float32)
        h_x = jnp.dot(x_ref[...], wx_ref[...],
                      preferred_element_type=jnp.float32) + bx_ref[...]
        out = out + h_x + bc2_ref[...] + jnp.dot(
            h_x.astype(jnp.bfloat16), wc2_ref[...],
            preferred_element_type=jnp.float32)
        out = jnp.maximum(out, 0.0)
        y = jnp.dot(out.astype(jnp.bfloat16), wf_ref[...],
                    preferred_element_type=jnp.float32) + bf_ref[...]
        o_ref[...] = y.astype(o_ref.dtype)


def linkx_forward(x, adj, params, *, tm=256, tk=512):
    """LINKX forward. x: [N, F_in], adj: dense [N, N], params: dict of 2-D arrays.

    Note: weights and A are cast to bf16 for the MXU / HBM-bandwidth fast path
    (A is exact; weights see <~0.4% per-element error, accumulation stays f32).
    """
    n, f_in = x.shape
    hidden = params["we"].shape[1]
    c_out = params["wf"].shape[1]

    assert tm % 8 == 0, "tm must be a multiple of 8 (sublane)"
    assert tk % 128 == 0, "tk must be a multiple of 128 (lane)"

    # Feature dims padded to lane width (lane-dense stores, full MXU N-dim).
    f_p = _round_up(f_in, 128)
    h_p = _round_up(hidden, 128)
    c_p = _round_up(c_out, 128)

    # Node dim: never use tiles larger than the (128-padded) node count, and
    # pad N so both tile sizes divide it exactly.
    n_128 = _round_up(n, 128)
    tm = min(tm, n_128)
    tk = min(tk, n_128)
    n_p = _round_up(n, math.lcm(tm, tk))
    assert n_p % tm == 0 and n_p % tk == 0, (n_p, tm, tk)

    bf16 = jnp.bfloat16
    # One-time cast+pad (the only wrapper-side copy of A; bf16 halves it).
    # TODO(synk): for very large graphs, accept a pre-padded/pre-cast bf16 (or
    # int8) adjacency to avoid even this one-time O(N^2) copy per call.
    a_p = _pad2d(adj, n_p, n_p, bf16)
    x_p = _pad2d(x, n_p, f_p, bf16)
    we = _pad2d(params["we"], n_p, h_p, bf16)
    wx = _pad2d(params["wx"], f_p, h_p, bf16)
    wc1 = _pad2d(params["wc1"], h_p, h_p, bf16)
    wc2 = _pad2d(params["wc2"], h_p, h_p, bf16)
    wf = _pad2d(params["wf"], h_p, c_p, bf16)
    be = _pad2d(params["be"], 1, h_p)        # biases stay f32
    bx = _pad2d(params["bx"], 1, h_p)
    bc1 = _pad2d(params["bc1"], 1, h_p)
    bc2 = _pad2d(params["bc2"], 1, h_p)
    bfin = _pad2d(params["bf"], 1, c_p)

    grid = (n_p // tm, n_p // tk)

    out = pl.pallas_call(
        _linkx_kernel,
        out_shape=jax.ShapeDtypeStruct((n_p, c_p), jnp.float32),
        grid_spec=pltpu.PrefetchScalarGridSpec(
            num_scalar_prefetch=0,
            grid=grid,
            in_specs=[
                pl.BlockSpec((tm, tk), lambda i, k: (i, k)),    # A tile (bf16)
                pl.BlockSpec((tk, h_p), lambda i, k: (k, 0)),   # W_edge tile (bf16)
                pl.BlockSpec((1, h_p), lambda i, k: (0, 0)),    # b_edge
                pl.BlockSpec((tm, f_p), lambda i, k: (i, 0)),   # X row tile (bf16)
                pl.BlockSpec((f_p, h_p), lambda i, k: (0, 0)),  # W_x (bf16)
                pl.BlockSpec((1, h_p), lambda i, k: (0, 0)),    # b_x
                pl.BlockSpec((h_p, h_p), lambda i, k: (0, 0)),  # W_c1 (bf16)
                pl.BlockSpec((1, h_p), lambda i, k: (0, 0)),    # b_c1
                pl.BlockSpec((h_p, h_p), lambda i, k: (0, 0)),  # W_c2 (bf16)
                pl.BlockSpec((1, h_p), lambda i, k: (0, 0)),    # b_c2
                pl.BlockSpec((h_p, c_p), lambda i, k: (0, 0)),  # W_f (bf16)
                pl.BlockSpec((1, c_p), lambda i, k: (0, 0)),    # b_f
            ],
            out_specs=pl.BlockSpec((tm, c_p), lambda i, k: (i, 0)),
            scratch_shapes=[pltpu.VMEM((tm, h_p), jnp.float32)],
        ),
        compiler_params=pltpu.CompilerParams(
            # Row tiles independent (megacore-parallel on v7x with >=2 tiles);
            # reduction axis last and "arbitrary" (accumulator carried).
            dimension_semantics=("parallel", "arbitrary"),
        ),
    )(a_p, we, be, x_p, wx, bx, wc1, bc1, wc2, bc2, wf, bfin)

    # TODO(synk): num_edge_layers > 1 path (ReLU + BatchNorm1d + edge MLP) not implemented.
    # TODO(synk): final MLP with num_layers > 1 (inter-layer act + batch_norm) not implemented.
    # TODO(synk): dropout skipped — identity at inference (training=False).
    return out[:n, :c_out]


# Pure-JAX reference (f32) for correctness validation.
def linkx_reference(x, adj, p):
    h_a = adj @ p["we"] + p["be"]
    out = h_a + (h_a @ p["wc1"] + p["bc1"])
    h_x = x @ p["wx"] + p["bx"]
    out = out + h_x + (h_x @ p["wc2"] + p["bc2"])
    return jnp.maximum(out, 0.0) @ p["wf"] + p["bf"]


if __name__ == "__main__":
    key = jax.random.PRNGKey(0)

    num_nodes = 512
    in_channels, hidden_channels, out_channels = 48, 96, 24

    keys = jax.random.split(key, 12)

    # Random symmetric binary adjacency, no self loops.
    a_rand = jax.random.bernoulli(keys[0], 0.05,
                                  (num_nodes, num_nodes)).astype(jnp.float32)
    adj = jnp.clip(a_rand + a_rand.T, 0.0, 1.0)
    adj = adj * (1.0 - jnp.eye(num_nodes, dtype=jnp.float32))

    x = jax.random.normal(keys[1], (num_nodes, in_channels), jnp.float32)

    def _uniform(k, shape, fan):
        bound = 1.0 / jnp.sqrt(jnp.float32(fan))
        return jax.random.uniform(k, shape, jnp.float32, -bound, bound)

    params = dict(
        we=_uniform(keys[2], (num_nodes, hidden_channels), num_nodes),
        be=_uniform(keys[3], (1, hidden_channels), num_nodes),
        wx=_uniform(keys[4], (in_channels, hidden_channels), in_channels),
        bx=_uniform(keys[5], (1, hidden_channels), in_channels),
        wc1=_uniform(keys[6], (hidden_channels, hidden_channels), hidden_channels),
        bc1=_uniform(keys[7], (1, hidden_channels), hidden_channels),
        wc2=_uniform(keys[8], (hidden_channels, hidden_channels), hidden_channels),
        bc2=_uniform(keys[9], (1, hidden_channels), hidden_channels),
        wf=_uniform(keys[10], (hidden_channels, out_channels), hidden_channels),
        bf=_uniform(keys[11], (1, out_channels), hidden_channels),
    )

    out = linkx_forward(x, adj, params)
    out = jax.block_until_ready(out)

    ref = linkx_reference(x, adj, params)
    assert out.shape == (num_nodes, out_channels)
    max_err = float(jnp.max(jnp.abs(out - ref)))
    assert jnp.allclose(out, ref, rtol=5e-2, atol=5e-2), max_err
    print("KERNEL_OK")
</pallas_src>

<mosaic_0001>
module attributes {stable_mosaic.version = 11 : i64} {
  func.func @_linkx_kernel(%arg0: i32, %arg1: i32, %arg2: memref<256x512xbf16, #tpu.memory_space<vmem>>, %arg3: memref<512x128xbf16, #tpu.memory_space<vmem>>, %arg4: memref<1x128xf32, #tpu.memory_space<vmem>>, %arg5: memref<256x128xbf16, #tpu.memory_space<vmem>>, %arg6: memref<128x128xbf16, #tpu.memory_space<vmem>>, %arg7: memref<1x128xf32, #tpu.memory_space<vmem>>, %arg8: memref<128x128xbf16, #tpu.memory_space<vmem>>, %arg9: memref<1x128xf32, #tpu.memory_space<vmem>>, %arg10: memref<128x128xbf16, #tpu.memory_space<vmem>>, %arg11: memref<1x128xf32, #tpu.memory_space<vmem>>, %arg12: memref<128x128xbf16, #tpu.memory_space<vmem>>, %arg13: memref<1x128xf32, #tpu.memory_space<vmem>>, %arg14: memref<256x128xf32, #tpu.memory_space<vmem>>, %arg15: memref<256x128xf32, #tpu.memory_space<vmem>>) attributes {dimension_semantics = [#tpu.dimension_semantics<parallel>, #tpu.dimension_semantics<arbitrary>], iteration_bounds = array<i64: 2, 1>, scalar_prefetch = 0 : i64, scratch_operands = 1 : i64, tpu.core_type = #tpu.core_type<tc>, window_params = [{transform_indices = @transform_0, window_bounds = array<i64: 256, 512>}, {transform_indices = @transform_1, window_bounds = array<i64: 512, 128>}, {pipeline_mode = #tpu.pipeline_mode<synchronous>, transform_indices = @transform_2, window_bounds = array<i64: 1, 128>}, {transform_indices = @transform_3, window_bounds = array<i64: 256, 128>}, {pipeline_mode = #tpu.pipeline_mode<synchronous>, transform_indices = @transform_4, window_bounds = array<i64: 128, 128>}, {pipeline_mode = #tpu.pipeline_mode<synchronous>, transform_indices = @transform_5, window_bounds = array<i64: 1, 128>}, {pipeline_mode = #tpu.pipeline_mode<synchronous>, transform_indices = @transform_6, window_bounds = array<i64: 128, 128>}, {pipeline_mode = #tpu.pipeline_mode<synchronous>, transform_indices = @transform_7, window_bounds = array<i64: 1, 128>}, {pipeline_mode = #tpu.pipeline_mode<synchronous>, transform_indices = @transform_8, window_bounds = array<i64: 128, 128>}, {pipeline_mode = #tpu.pipeline_mode<synchronous>, transform_indices = @transform_9, window_bounds = array<i64: 1, 128>}, {pipeline_mode = #tpu.pipeline_mode<synchronous>, transform_indices = @transform_10, window_bounds = array<i64: 128, 128>}, {pipeline_mode = #tpu.pipeline_mode<synchronous>, transform_indices = @transform_11, window_bounds = array<i64: 1, 128>}, {transform_indices = @transform_12, window_bounds = array<i64: 256, 128>}]} {
    %c0_i32 = arith.constant 0 : i32
    %0 = arith.cmpi eq, %arg1, %c0_i32 : i32
    %1 = arith.extui %0 : i1 to i32
    %c0_i32_0 = arith.constant 0 : i32
    %2 = arith.cmpi ne, %1, %c0_i32_0 : i32
    scf.if %2 {
      %cst_10 = arith.constant 0.000000e+00 : f32
      %12 = vector.broadcast %cst_10 : f32 to vector<256x128xf32>
      %c0_11 = arith.constant 0 : index
      %c0_12 = arith.constant 0 : index
      %13 = vector.load %arg15[%c0_11, %c0_12] : memref<256x128xf32, #tpu.memory_space<vmem>>, vector<256x128xf32>
      tpu.vector_store %arg15[%c0_11, %c0_12], %12 {strides = array<i32>} : memref<256x128xf32, #tpu.memory_space<vmem>>, vector<256x128xf32>,
    } else {
    }
    %c0 = arith.constant 0 : index
    %c0_1 = arith.constant 0 : index
    %3 = vector.load %arg15[%c0, %c0_1] : memref<256x128xf32, #tpu.memory_space<vmem>>, vector<256x128xf32>
    %c0_2 = arith.constant 0 : index
    %c0_3 = arith.constant 0 : index
    %4 = vector.load %arg2[%c0_2, %c0_3] : memref<256x512xbf16, #tpu.memory_space<vmem>>, vector<256x512xbf16>
    %c0_4 = arith.constant 0 : index
    %c0_5 = arith.constant 0 : index
    %5 = vector.load %arg3[%c0_4, %c0_5] : memref<512x128xbf16, #tpu.memory_space<vmem>>, vector<512x128xbf16>
    %cst = arith.constant dense<0.000000e+00> : vector<256x128xf32>
    %6 = tpu.matmul %4, %5, %cst {dimension_numbers = #tpu.dot_dimension_numbers<[1], [0], [0], [1], [0, 0, 1, 1], [], []>} : vector<256x512xbf16>, vector<512x128xbf16>, vector<256x128xf32> -> vector<256x128xf32>
    %7 = arith.addf %3, %6 : vector<256x128xf32>
    %c0_6 = arith.constant 0 : index
    %c0_7 = arith.constant 0 : index
    %8 = vector.load %arg15[%c0_6, %c0_7] : memref<256x128xf32, #tpu.memory_space<vmem>>, vector<256x128xf32>
    tpu.vector_store %arg15[%c0_6, %c0_7], %7 {strides = array<i32>} : memref<256x128xf32, #tpu.memory_space<vmem>>, vector<256x128xf32>,
    %c0_i32_8 = arith.constant 0 : i32
    %9 = arith.cmpi eq, %arg1, %c0_i32_8 : i32
    %10 = arith.extui %9 : i1 to i32
    %c0_i32_9 = arith.constant 0 : i32
    %11 = arith.cmpi ne, %10, %c0_i32_9 : i32
    scf.if %11 {
      %c0_10 = arith.constant 0 : index
      %c0_11 = arith.constant 0 : index
      %12 = vector.load %arg15[%c0_10, %c0_11] : memref<256x128xf32, #tpu.memory_space<vmem>>, vector<256x128xf32>
      %c0_12 = arith.constant 0 : index
      %c0_13 = arith.constant 0 : index
      %13 = vector.load %arg4[%c0_12, %c0_13] : memref<1x128xf32, #tpu.memory_space<vmem>>, vector<1x128xf32>
      %14 = vector.broadcast %13 : vector<1x128xf32> to vector<256x128xf32>
      %15 = arith.addf %12, %14 : vector<256x128xf32>
      %c0_14 = arith.constant 0 : index
      %c0_15 = arith.constant 0 : index
      %16 = vector.load %arg9[%c0_14, %c0_15] : memref<1x128xf32, #tpu.memory_space<vmem>>, vector<1x128xf32>
      %17 = vector.broadcast %16 : vector<1x128xf32> to vector<256x128xf32>
      %18 = arith.addf %15, %17 : vector<256x128xf32>
      %19 = arith.truncf %15 : vector<256x128xf32> to vector<256x128xbf16>
      %c0_16 = arith.constant 0 : index
      %c0_17 = arith.constant 0 : index
      %20 = vector.load %arg8[%c0_16, %c0_17] : memref<128x128xbf16, #tpu.memory_space<vmem>>, vector<128x128xbf16>
      %cst_18 = arith.constant dense<0.000000e+00> : vector<256x128xf32>
      %21 = tpu.matmul %19, %20, %cst_18 {dimension_numbers = #tpu.dot_dimension_numbers<[1], [0], [0], [1], [0, 0, 1, 1], [], []>} : vector<256x128xbf16>, vector<128x128xbf16>, vector<256x128xf32> -> vector<256x128xf32>
      %22 = arith.addf %18, %21 : vector<256x128xf32>
      %c0_19 = arith.constant 0 : index
      %c0_20 = arith.constant 0 : index
      %23 = vector.load %arg5[%c0_19, %c0_20] : memref<256x128xbf16, #tpu.memory_space<vmem>>, vector<256x128xbf16>
      %c0_21 = arith.constant 0 : index
      %c0_22 = arith.constant 0 : index
      %24 = vector.load %arg6[%c0_21, %c0_22] : memref<128x128xbf16, #tpu.memory_space<vmem>>, vector<128x128xbf16>
      %cst_23 = arith.constant dense<0.000000e+00> : vector<256x128xf32>
      %25 = tpu.matmul %23, %24, %cst_23 {dimension_numbers = #tpu.dot_dimension_numbers<[1], [0], [0], [1], [0, 0, 1, 1], [], []>} : vector<256x128xbf16>, vector<128x128xbf16>, vector<256x128xf32> -> vector<256x128xf32>
      %c0_24 = arith.constant 0 : index
      %c0_25 = arith.constant 0 : index
      %26 = vector.load %arg7[%c0_24, %c0_25] : memref<1x128xf32, #tpu.memory_space<vmem>>, vector<1x128xf32>
      %27 = vector.broadcast %26 : vector<1x128xf32> to vector<256x128xf32>
      %28 = arith.addf %25, %27 : vector<256x128xf32>
      %29 = arith.addf %22, %28 : vector<256x128xf32>
      %c0_26 = arith.constant 0 : index
      %c0_27 = arith.constant 0 : index
      %30 = vector.load %arg11[%c0_26, %c0_27] : memref<1x128xf32, #tpu.memory_space<vmem>>, vector<1x128xf32>
      %31 = vector.broadcast %30 : vector<1x128xf32> to vector<256x128xf32>
      %32 = arith.addf %29, %31 : vector<256x128xf32>
      %33 = arith.truncf %28 : vector<256x128xf32> to vector<256x128xbf16>
      %c0_28 = arith.constant 0 : index
      %c0_29 = arith.constant 0 : index
      %34 = vector.load %arg10[%c0_28, %c0_29] : memref<128x128xbf16, #tpu.memory_space<vmem>>, vector<128x128xbf16>
      %cst_30 = arith.constant dense<0.000000e+00> : vector<256x128xf32>
      %35 = tpu.matmul %33, %34, %cst_30 {dimension_numbers = #tpu.dot_dimension_numbers<[1], [0], [0], [1], [0, 0, 1, 1], [], []>} : vector<256x128xbf16>, vector<128x128xbf16>, vector<256x128xf32> -> vector<256x128xf32>
      %36 = arith.addf %32, %35 : vector<256x128xf32>
      %cst_31 = arith.constant 0.000000e+00 : f32
      %37 = vector.broadcast %cst_31 : f32 to vector<256x128xf32>
      %38 = arith.maximumf %36, %37 : vector<256x128xf32>
      %39 = arith.truncf %38 : vector<256x128xf32> to vector<256x128xbf16>
      %c0_32 = arith.constant 0 : index
      %c0_33 = arith.constant 0 : index
      %40 = vector.load %arg12[%c0_32, %c0_33] : memref<128x128xbf16, #tpu.memory_space<vmem>>, vector<128x128xbf16>
      %cst_34 = arith.constant dense<0.000000e+00> : vector<256x128xf32>
      %41 = tpu.matmul %39, %40, %cst_34 {dimension_numbers = #tpu.dot_dimension_numbers<[1], [0], [0], [1], [0, 0, 1, 1], [], []>} : vector<256x128xbf16>, vector<128x128xbf16>, vector<256x128xf32> -> vector<256x128xf32>
      %c0_35 = arith.constant 0 : index
      %c0_36 = arith.constant 0 : index
      %42 = vector.load %arg13[%c0_35, %c0_36] : memref<1x128xf32, #tpu.memory_space<vmem>>, vector<1x128xf32>
      %43 = vector.broadcast %42 : vector<1x128xf32> to vector<256x128xf32>
      %44 = arith.addf %41, %43 : vector<256x128xf32>
      %c0_37 = arith.constant 0 : index
      %c0_38 = arith.constant 0 : index
      %45 = vector.load %arg14[%c0_37, %c0_38] : memref<256x128xf32, #tpu.memory_space<vmem>>, vector<256x128xf32>
      tpu.vector_store %arg14[%c0_37, %c0_38], %44 {strides = array<i32>} : memref<256x128xf32, #tpu.memory_space<vmem>>, vector<256x128xf32>,
    } else {
    }
    return
  }
  func.func @transform_0(%arg0: i32, %arg1: i32) -> (i32, i32) {
    %c0_i32 = arith.constant 0 : i32
    return %arg0, %arg1 : i32, i32
  }
  func.func @transform_1(%arg0: i32, %arg1: i32) -> (i32, i32) {
    %c0_i32 = arith.constant 0 : i32
    %c0_i32_0 = arith.constant 0 : i32
    return %arg1, %c0_i32 : i32, i32
  }
  func.func @transform_2(%arg0: i32, %arg1: i32) -> (i32, i32) {
    %c0_i32 = arith.constant 0 : i32
    %c0_i32_0 = arith.constant 0 : i32
    %c0_i32_1 = arith.constant 0 : i32
    return %c0_i32, %c0_i32_0 : i32, i32
  }
  func.func @transform_3(%arg0: i32, %arg1: i32) -> (i32, i32) {
    %c0_i32 = arith.constant 0 : i32
    %c0_i32_0 = arith.constant 0 : i32
    return %arg0, %c0_i32 : i32, i32
  }
  func.func @transform_4(%arg0: i32, %arg1: i32) -> (i32, i32) {
    %c0_i32 = arith.constant 0 : i32
    %c0_i32_0 = arith.constant 0 : i32
    %c0_i32_1 = arith.constant 0 : i32
    return %c0_i32, %c0_i32_0 : i32, i32
  }
  func.func @transform_5(%arg0: i32, %arg1: i32) -> (i32, i32) {
    %c0_i32 = arith.constant 0 : i32
    %c0_i32_0 = arith.constant 0 : i32
    %c0_i32_1 = arith.constant 0 : i32
    return %c0_i32, %c0_i32_0 : i32, i32
  }
  func.func @transform_6(%arg0: i32, %arg1: i32) -> (i32, i32) {
    %c0_i32 = arith.constant 0 : i32
    %c0_i32_0 = arith.constant 0 : i32
    %c0_i32_1 = arith.constant 0 : i32
    return %c0_i32, %c0_i32_0 : i32, i32
  }
  func.func @transform_7(%arg0: i32, %arg1: i32) -> (i32, i32) {
    %c0_i32 = arith.constant 0 : i32
    %c0_i32_0 = arith.constant 0 : i32
    %c0_i32_1 = arith.constant 0 : i32
    return %c0_i32, %c0_i32_0 : i32, i32
  }
  func.func @transform_8(%arg0: i32, %arg1: i32) -> (i32, i32) {
    %c0_i32 = arith.constant 0 : i32
    %c0_i32_0 = arith.constant 0 : i32
    %c0_i32_1 = arith.constant 0 : i32
    return %c0_i32, %c0_i32_0 : i32, i32
  }
  func.func @transform_9(%arg0: i32, %arg1: i32) -> (i32, i32) {
    %c0_i32 = arith.constant 0 : i32
    %c0_i32_0 = arith.constant 0 : i32
    %c0_i32_1 = arith.constant 0 : i32
    return %c0_i32, %c0_i32_0 : i32, i32
  }
  func.func @transform_10(%arg0: i32, %arg1: i32) -> (i32, i32) {
    %c0_i32 = arith.constant 0 : i32
    %c0_i32_0 = arith.constant 0 : i32
    %c0_i32_1 = arith.constant 0 : i32
    return %c0_i32, %c0_i32_0 : i32, i32
  }
  func.func @transform_11(%arg0: i32, %arg1: i32) -> (i32, i32) {
    %c0_i32 = arith.constant 0 : i32
    %c0_i32_0 = arith.constant 0 : i32
    %c0_i32_1 = arith.constant 0 : i32
    return %c0_i32, %c0_i32_0 : i32, i32
  }
  func.func @transform_12(%arg0: i32, %arg1: i32) -> (i32, i32) {
    %c0_i32 = arith.constant 0 : i32
    %c0_i32_0 = arith.constant 0 : i32
    return %arg0, %c0_i32 : i32, i32
  }
}

</mosaic_0001>

<bundles_post_ra>
// kernel: tpu_custom_call.1
= control target key start
LH: loop header
LB: loop body
LE: loop exit
PB: predicated region body
PF: predicated region fallthrough
CT: control target
= control target key end

     0   :  { %s5500_s0 = inlined_call_operand.hbm [shape: bf16[512,512], index: 0, kind: input, shape index: {}]   ;;  %s5501_s1 = inlined_call_operand.hbm [shape: bf16[512,128], index: 1, kind: input, shape index: {}]   ;;  %s5502_s2 = inlined_call_operand.vmem [shape: f32[1,128], index: 2, kind: input, shape index: {}]   ;;  %s5503_s3 = inlined_call_operand.hbm [shape: bf16[512,128], index: 3, kind: input, shape index: {}]   ;;  %s5504_s4 = inlined_call_operand.hbm [shape: bf16[128,128], index: 4, kind: input, shape index: {}]   ;;  %s5505_s5 = inlined_call_operand.vmem [shape: f32[1,128], index: 5, kind: input, shape index: {}]   ;;  %s5506_s6 = inlined_call_operand.hbm [shape: bf16[128,128], index: 6, kind: input, shape index: {}]   ;;  %s5507_s7 = inlined_call_operand.vmem [shape: f32[1,128], index: 7, kind: input, shape index: {}]   ;;  %s5508_s8 = inlined_call_operand.hbm [shape: bf16[128,128], index: 8, kind: input, shape index: {}]   ;;  %s5509_s9 = inlined_call_operand.vmem [shape: f32[1,128], index: 9, kind: input, shape index: {}]   ;;  %s5510_s10 = inlined_call_operand.hbm [shape: bf16[128,128], index: 10, kind: input, shape index: {}]   ;;  %s5511_s11 = inlined_call_operand.vmem [shape: f32[1,128], index: 11, kind: input, shape index: {}]   ;;  %s5512_s12 = inlined_call_operand.hbm [shape: f32[512,128], index: 12, kind: output, shape index: {}]  }
   0x1   :  { %5547 = sst [smem:[#allocation62_spill]] %s5500_s0 }
   0x2   :  { %5548 = sst [smem:[#allocation63_spill]] %s5501_s1 }
   0x3   :  { %5549 = sst [smem:[#allocation64_spill]] %s5506_s6 }
   0x4   :  { %5550 = sst [smem:[#allocation65_spill]] %s5507_s7 }
   0x5   :  { %5551 = sst [smem:[#allocation66_spill]] %s5509_s9 }
   0x6   :  { %5552 = sst [smem:[#allocation67_spill]] %s5511_s11 }
   0x7   :  { %5553 = sst [smem:[#allocation68_spill]] %s5512_s12 }
   0x8   :  { %17 = vsyncpa [#allocation4], 0 }
   0x9   :  { %19 = vsyncpa [#allocation4 + $0x1], 0 }
   0xa   :  { %20 = vsyncpa [#allocation7], 0 }
   0xb   :  { %21 = vsyncpa [#allocation11], 0 }
   0xc   :  { %22 = vsyncpa [#allocation14], 0 }
   0xd   :  { %23 = vsyncpa [#allocation5], 0 }
   0xe   :  { %25 = vsyncpa [#allocation5 + $0x1], 0  ;;  %s4599_s21 = smov 0   ;;  %s4601_s22 = smov 0  }
   0xf   :  { %s4603_s23 = smov 0   ;;  %s4605_s24 = smov 0  }
  0x10   :  { %s4607_s25 = smov 0   ;;  %s4609_s26 = smov 0  }
  0x11 LB: > { %5554 = sst [smem:[#allocation23_spill]] %s4498_s21  ;;  %s4630_s27 = sadd.s32 4294967295, %s4518_s26   ;;  %s4518_s26 = sphi %s4609_s26, %s31_s26   ;;  %s4514_s25 = sphi %s4607_s25, %s5663_s25   ;;  %s4510_s24 = sphi %s4605_s24, %s5662_s24   ;;  %s4506_s23 = sphi %s4603_s23, %s5661_s23   ;;  %s4502_s22 = sphi %s4601_s22, %s5660_s22   ;;  %s4498_s21 = sphi %s4599_s21, %s5659_s21  }
  0x12   : > { %5555 = sst [smem:[#allocation24_spill]] %s4506_s23  ;;  %p3239_p0 = scmp.ge.s32.totalorder %s4518_s26, 1 }
  0x13   : > { %5556 = sst [smem:[#allocation25_spill]] %s4510_s24  ;;  %p5521_p1 = scmp.eq.s32.totalorder %s4630_s27, 0 }
  0x14   : > { %p343_p2 = scmp.lt.s32.totalorder %s4518_s26, 3  ;;  %s4520_s29 = smov [#allocation6]  }
  0x15   : > { %s358_s30 = sshll.u32 %s4520_s29, 4  ;;  %s4521_s14 = smov [#allocation10]   ;;  %s359_s30 = int_to_ptr.vmem [resolvable:$true] %s358_s30 }
  0x16   : > { %p4635_p3 = pnand %p3239_p0, %p343_p2  ;;  %s390_s15 = sshll.u32 %s4521_s14, 4  ;;  %s391_s15 = int_to_ptr.vmem [resolvable:$true] %s390_s15 }
  0x17   : > { %s4243_s17 = scalar_lea.vmem %s359_s30, 4096  ;;  %p4251_p11 = scmp.lt.s32.totalorder %s359_s30, %s359_s30 }
  0x18   : > { %p3958_p4 = pneg %p4635_p3  ;;  %p4244_p8 = scmp.ne.s32.totalorder %s359_s30, %s4243_s17 }
  0x19   : > { %p4252_p12 = scmp.lt.s32.totalorder %s4243_s17, %s4243_s17 }
  0x1a   : > { %p4644_p6 = pnand %p3958_p4, %p5521_p1 }
  0x1b   : > { %p4253_p13 = por %p4252_p12, %p4251_p11 }
  0x1c   : > { %p4650_p7 = pneg %p4644_p6 }
  0x1e   : > { %p4246_p9 = pnand %p4244_p8, %p4650_p7 }
  0x20   : > { %p4247_p10 = pneg %p4246_p9 }
  0x22   : > { %p4254_p0 = pnand %p4253_p13, %p4247_p10 }
  0x24   : > { %4257 = shalt.err (!%p4254_p0)
}
  0x25   : > { %s5514_s18 = smov 64   ;;  %s5516_s19 = smov 4  }
  0x26   : > { %s5560_s1 = sld [smem:[#allocation63_spill]]  ;;  %s4269_s14 = scalar_lea.vmem %s391_s15, 1024 }
  0x27   : > { %p4270_p2 = scmp.ne.s32.totalorder %s391_s15, %s4269_s14  ;;  %p4277_p9 = scmp.lt.s32.totalorder %s391_s15, %s391_s15 }
  0x28   : > { %p4278_p10 = scmp.lt.s32.totalorder %s4269_s14, %s4269_s14 }
  0x29   : > { %p4272_p4 = pnand %p4270_p2, %p4650_p7 }
  0x2a   : > { %p4279_p11 = por %p4278_p10, %p4277_p9 }
  0x2b   : > { %p4273_p8 = pneg %p4272_p4 }
  0x2c   : > { %3961 = dma.hbm_to_vmem [thread:$0]  (!%p4644_p6), %s5560_s1, 4096, %s359_s30, [#allocation7], %s5514_s18, %s5514_s18, %s5516_s19  }
  0x2d   : > { %p4280_p12 = pnand %p4279_p11, %p4273_p8 }
  0x2f   : > { %4283 = shalt.err (!%p4280_p12)
}
  0x30   : > { %s5561_s6 = sld [smem:[#allocation64_spill]]  ;;  %s3238_s30 = sadd.s32 4294967294, %s4518_s26  }
  0x31   : > { %s43_s20 = sadd.s32 1, %s4514_s25  ;;  %s52_s29 = sadd.s32 1, %s4506_s23 }
  0x32   : > { %p45_p13 = scmp.ge.s32.totalorder %s43_s20, 2  ;;  %p59_p0 = scmp.ne.s32.totalorder %s4506_s23, %s4502_s22 }
  0x33   : > { %p60_p2 = scmp.eq.s32.totalorder %s4518_s26, 0  ;;  %p65_p8 = scmp.ne.s32.totalorder %s4502_s22, %s4498_s21 }
  0x34   : > { %s5665_s20 = smov (%p45_p13, %s43_s20), 0  ;;  %p330_p9 = scmp.eq.s32.totalorder %s4630_s27, 1 }
  0x35   : > { %5562 = sst [smem:[#allocation26_spill]] %s5665_s20  ;;  %p4682_p4 = por %p60_p2, %p59_p0 }
  0x36   : > { %3967 = dma.hbm_to_vmem [thread:$0]  (!%p4644_p6), %s5561_s6, 1024, %s391_s15, [#allocation11], %s5514_s18, %s5514_s18, %s5516_s19  }
  0x37   : > { %s47_s15 = ssub.s32 %s4514_s25, %s5665_s20  ;;  %p4693_p11 = por %p5521_p1, %p65_p8 }
  0x38   : > { %p50_p10 = scmp.eq.s32.totalorder %s47_s15, 0  ;;  %p4697_p12 = por %p330_p9, %p59_p0 }
  0x39   : > { %p336_p13 = scmp.eq.s32.totalorder %s3238_s30, 1  ;;  %p3990_p5 = scmp.lt.s32.totalorder %s4518_s26, 2 }
  0x3a   : > { %s4702_s18 = scalar_select %p50_p10, %s4506_s23, %s52_s29  }
  0x3b   : > { %p4704_p2 = por %p336_p13, %p65_p8  ;;  %s439_s1 = sand.u32 1, %s4518_s26  }
  0x3c   : > { %5566 = sst [smem:[#allocation27_spill]] %s4702_s18  ;;  %s441_s6 = sand.u32 1, %s4506_s23  }
  0x3d   : > { %s5567_s19 = scalar_select %p4704_p2, 1, 0 }
  0x3e   : > { %s3246_s15 = sshll.u32 %s441_s6, 9  ;;  %s3417_s20 = sshll.u32 %s4514_s25, 13 }
  0x3f   : > { %s5568_s0 = sld [smem:[#allocation62_spill]]  ;;  %s443_s9 = scalar_lea.vmem [#allocation3], %s3246_s15 }
  0x40   : > { %s453_s7 = sshll.u32 %s443_s9, 4  ;;  %p4717_p0 = pnand %p3990_p5, %p4682_p4  ;;  %s454_s7 = int_to_ptr.vmem [resolvable:$true] %s453_s7 }
  0x41   : > { %s3250_s29 = sshll.u32 %s441_s6, 7  ;;  %s4721_s18 = scalar_lea.sflag [#allocation4], %s439_s1 }
  0x42   : > { %p4286_p8 = pneg %p4717_p0  ;;  %s4297_s23 = scalar_lea.vmem %s454_s7, 8192 }
  0x43   : > { %p4298_p9 = scmp.ne.s32.totalorder %s454_s7, %s4297_s23  ;;  %s4524_s9 = smov [#allocation3]  }
  0x44   : > { %s4302_s21 = sshll.u32 %s4524_s9, 4  ;;  %s4303_s21 = int_to_ptr.vmem [resolvable:$false] %s4302_s21 }
  0x45   : > { %s452_s11 = scalar_lea.hbm %s5568_s0, %s3417_s20  ;;  %p4300_p10 = pnand %p4298_p9, %p4286_p8 }
  0x46   : > { %s4304_s24 = scalar_lea.vmem %s4303_s21, 16384  ;;  %p4305_p5 = scmp.lt.s32.totalorder %s454_s7, %s4303_s21 }
  0x47   : > { %p4301_p13 = pneg %p4300_p10  ;;  %p4306_p4 = scmp.lt.s32.totalorder %s4304_s24, %s4297_s23 }
  0x49   : > { %p4307_p1 = por %p4306_p4, %p4305_p5 }
  0x4b   : > { %p4308_p2 = pnand %p4307_p1, %p4301_p13 }
  0x4d   : > { %4311 = shalt.err (!%p4308_p2)
}
  0x4e   : > { %s4525_s6 = smov 256   ;;  %s4526_s1 = smov 16  }
  0x4f   : > { %3977 = dma.hbm_to_vmem [thread:$0]  (!%p4717_p0), %s452_s11, 8192, %s454_s7, %s4721_s18, %s4525_s6, %s4525_s6, %s4526_s1  }
  0x50   : > { %s467_s20 = scalar_lea.vmem [#allocation8], %s3250_s29  ;;  %s4527_s15 = smov [#allocation9]  }
  0x51   : > { %s4731_s12 = sshll.u32 %s467_s20, 4  ;;  %s374_s0 = sshll.u32 %s4527_s15, 4  ;;  %s375_s0 = int_to_ptr.vmem [resolvable:$true] %s374_s0  ;;  %s475_s12 = int_to_ptr.vmem [resolvable:$true] %s4731_s12 }
  0x52   : > { %s4323_s9 = scalar_lea.vmem %s375_s0, 1024  ;;  %p4331_p1 = scmp.lt.s32.totalorder %s375_s0, %s375_s0 }
  0x53   : > { %p4324_p9 = scmp.ne.s32.totalorder %s375_s0, %s4323_s9  ;;  %p4332_p2 = scmp.lt.s32.totalorder %s4323_s9, %s4323_s9 }
  0x55   : > { %p4326_p10 = pnand %p4324_p9, %p4650_p7  ;;  %p4333_p13 = por %p4332_p2, %p4331_p1 }
  0x57   : > { %p4327_p5 = pneg %p4326_p10 }
  0x59   : > { %p4334_p4 = pnand %p4333_p13, %p4327_p5 }
  0x5b   : > { %4337 = shalt.err (!%p4334_p4)
}
  0x5c   : > { %s5570_s23 = smov 4   ;;  %s5571_s7 = smov 64  }
  0x5d   : > { %3964 = dma.hbm_to_vmem [thread:$0]  (!%p4644_p6), %s5504_s4, 1024, %s375_s0, [#allocation7], %s5571_s7, %s5571_s7, %s5570_s23  }
  0x5e   : > { %s4528_s21 = smov [#allocation12]   ;;  %s4529_s6 = smov [#allocation13]  }
  0x5f   : > { %s406_s24 = sshll.u32 %s4528_s21, 4  ;;  %s422_s1 = sshll.u32 %s4529_s6, 4  ;;  %s407_s24 = int_to_ptr.vmem [resolvable:$true] %s406_s24  ;;  %s423_s1 = int_to_ptr.vmem [resolvable:$true] %s422_s1 }
  0x60   : > { %s4349_s20 = scalar_lea.vmem %s407_s24, 1024  ;;  %p4357_p1 = scmp.lt.s32.totalorder %s407_s24, %s407_s24 }
  0x61   : > { %p4350_p9 = scmp.ne.s32.totalorder %s407_s24, %s4349_s20  ;;  %p4358_p2 = scmp.lt.s32.totalorder %s4349_s20, %s4349_s20 }
  0x63   : > { %p4352_p10 = pnand %p4350_p9, %p4650_p7  ;;  %p4359_p13 = por %p4358_p2, %p4357_p1 }
  0x65   : > { %p4353_p5 = pneg %p4352_p10 }
  0x67   : > { %p4360_p4 = pnand %p4359_p13, %p4353_p5 }
  0x69   : > { %4363 = shalt.err (!%p4360_p4)
}
  0x6a   : > { %3970 = dma.hbm_to_vmem [thread:$0]  (!%p4644_p6), %s5508_s8, 1024, %s407_s24, [#allocation11], %s5571_s7, %s5571_s7, %s5570_s23  }
  0x6b   : > { %s3418_s9 = sshll.u32 %s4514_s25, 11  ;;  %s4375_s11 = scalar_lea.vmem %s423_s1, 1024 }
  0x6c   : > { %p4376_p9 = scmp.ne.s32.totalorder %s423_s1, %s4375_s11  ;;  %p4383_p5 = scmp.lt.s32.totalorder %s423_s1, %s423_s1 }
  0x6d   : > { %p4384_p2 = scmp.lt.s32.totalorder %s4375_s11, %s4375_s11 }
  0x6e   : > { %p4378_p10 = pnand %p4376_p9, %p4650_p7 }
  0x6f   : > { %p4385_p13 = por %p4384_p2, %p4383_p5 }
  0x70   : > { %p4379_p1 = pneg %p4378_p10 }
  0x72   : > { %p4386_p4 = pnand %p4385_p13, %p4379_p1 }
  0x74   : > { %4389 = shalt.err (!%p4386_p4)
}
  0x75   : > { %3973 = dma.hbm_to_vmem [thread:$0]  (!%p4644_p6), %s5510_s10, 1024, %s423_s1, [#allocation14], %s5571_s7, %s5571_s7, %s5570_s23  }
  0x76   : > { %s473_s6 = scalar_lea.hbm %s5503_s3, %s3418_s9  ;;  %s4403_s20 = scalar_lea.vmem %s475_s12, 2048 }
  0x77   : > { %p4404_p7 = scmp.ne.s32.totalorder %s475_s12, %s4403_s20  ;;  %s4530_s13 = smov [#allocation8]  }
  0x78   : > { %s4408_s0 = sshll.u32 %s4530_s13, 4  ;;  %s4409_s0 = int_to_ptr.vmem [resolvable:$false] %s4408_s0 }
  0x79   : > { %p4406_p9 = pnand %p4404_p7, %p4286_p8  ;;  %s4410_s15 = scalar_lea.vmem %s4409_s0, 4096 }
  0x7a   : > { %p4411_p1 = scmp.lt.s32.totalorder %s475_s12, %s4409_s0  ;;  %p4412_p5 = scmp.lt.s32.totalorder %s4410_s15, %s4403_s20 }
  0x7b   : > { %p4407_p10 = pneg %p4406_p9 }
  0x7c   : > { %p4413_p2 = por %p4412_p5, %p4411_p1 }
  0x7e   : > { %p4414_p13 = pnand %p4413_p2, %p4407_p10 }
  0x80   : > { %4417 = shalt.err (!%p4414_p13)
}
  0x81   : > { %3980 = dma.hbm_to_vmem [thread:$0]  (!%p4717_p0), %s473_s6, 2048, %s475_s12, %s4721_s18, %s5571_s7, %s5571_s7, %s5570_s23  }
  0x82   : > { %486 = sbr.rel (%p4635_p3) target bundleno = 1001 (0x3e9), region = 68 }
  0x87   : > { %s488_s1 = sand.u32 1, %s4630_s27   ;;  %s4781_s9 = sand.u32 1, %s4502_s22  }
  0x88   : > { %s3254_s11 = sshll.u32 %s4781_s9, 9  ;;  %s489_s29 = scalar_lea.sflag [#allocation4], %s488_s1 }
  0x89   : > { %s4784_s21 = scalar_lea.vmem [#allocation3], %s3254_s11 }
  0x8a   : > { %4469 = dma.done.wait (%p4693_p11), %s489_s29, 8192  }
  0x8b   : > { %4471 = vsyncadd (%p4693_p11), %s489_s29, 4294959104  ;;  %p5572_p6 = scmp.eq.s32.totalorder %s4630_s27, 0 }
  0x8d   : > { %4473 = dma.done.wait (%p5572_p6), [#allocation7], 4096   ;;  %p5573_p3 = pmov %p5572_p6 }
  0x8e   : > { %s3256_s28 = sshll.u32 %s4781_s9, 7 }
  0x8f   : > { %4475 = vsyncadd (%p5573_p3), [#allocation7], 4294963200  ;;  %s4795_s18 = scalar_lea.vmem [#allocation8], %s3256_s28 }
  0x90   : > { %4477 = dma.done.wait (%p4693_p11), %s489_s29, 2048  }
  0x91   : > { %4479 = vsyncadd (%p4693_p11), %s489_s29, 4294965248  ;;  %p5574_p0 = pmov %p5573_p3 }
  0x93   : > { %4481 = dma.done.wait (%p5574_p0), [#allocation7], 1024   ;;  %p5575_p8 = pmov %p5574_p0 }
  0x94   : > { %p5576_p4 = pmov %p5574_p0 }
  0x95   : > { %4483 = vsyncadd (%p5575_p8), [#allocation7], 4294966272 }
  0x96   : > { %4485 = dma.done.wait (%p5576_p4), [#allocation11], 2048   ;;  %p5577_p7 = pmov %p5574_p0 }
  0x97   : > { %p5578_p9 = pmov %p5574_p0 }
  0x98   : > { %4487 = vsyncadd (%p5577_p7), [#allocation11], 4294965248 }
  0x99   : > { %4489 = dma.done.wait (%p5578_p9), [#allocation14], 1024   ;;  %p5579_p10 = pmov %p5574_p0 }
  0x9a   : > { %v4056_v0 = vld [vmem:[#allocation6 + $0x78] sm:$0xff]   ;;  %v4060_v4 = vld [vmem:[#allocation6 + $0x70] sm:$0xff]   ;;  %v4064_v8 = vld [vmem:[#allocation6 + $0x68] sm:$0xff]   ;;  %s5605_s24 = sld [smem:[#allocation65_spill]]  ;;  %s3261_s13 = sshll.u32 %s4781_s9, 8 }
  0x9b   : > { %4491 = vsyncadd (%p5579_p10), [#allocation14], 4294966272  ;;  %v4057_v1 = vld [vmem:[#allocation6 + $0xf8] sm:$0xff]   ;;  %3420 = vmatprep.subr.bf16.mxu0 %v4056_v0  ;;  %v4061_v5 = vld [vmem:[#allocation6 + $0xf0] sm:$0xff]   ;;  %s5615_s20 = sld [smem:[#allocation66_spill]]  ;;  %s5380_s11 = scalar_lea.vmem [#allocation15], %s3261_s13 }
  0x9c   : > { %v4058_v2 = vld [vmem:[#allocation6 + $0x38] sm:$0xff]   ;;  %3532 = vmatprep.subr.bf16.mxu1 %v4057_v1  ;;  %v4062_v6 = vld [vmem:[#allocation6 + $0x30] sm:$0xff]   ;;  %v4065_v9 = vld [vmem:[#allocation6 + $0xe8] sm:$0xff]   ;;  %s5650_s1 = sld [smem:[#allocation67_spill]]  ;;  %s3083_s28 = sshll.u32 %s5380_s11, 4  ;;  %s5449_s28 = int_to_ptr.vmem [resolvable:$true] %s3083_s28 }
  0x9d   : > { %v4059_v3 = vld [vmem:[#allocation6 + $0xb8] sm:$0xff]   ;;  %3421 = vmatpush3.bf16.msra.mxu0 %v4058_v2  ;;  %v4063_v7 = vld [vmem:[#allocation6 + $0xb0] sm:$0xff]   ;;  %v4066_v10 = vld [vmem:[#allocation6 + $0x28] sm:$0xff]   ;;  %s5651_s29 = sld [smem:[#allocation25_spill]]  ;;  %s3070_s12 = scalar_lea.sflag [#allocation5], %s4781_s9 }
  0x9e   : > { %3533 = vmatpush3.bf16.msra.mxu1 %v4059_v3  ;;  %3422 = vmatprep.subr.bf16.mxu0 %v4060_v4  ;;  %v4067_v11 = vld [vmem:[#allocation6 + $0xa8] sm:$0xff]   ;;  %v4068_v12 = vld [vmem:[#allocation6 + $0x60] sm:$0xff]   ;;  %v4072_v16 = vld [vmem:[#allocation6 + $0x58] sm:$0xff]   ;;  %s5652_s14 = sld [smem:[#allocation68_spill]]  ;;  %s4418_s23 = scalar_lea.vmem %s5449_s28, 4096 }
  0x9f   : > { %3534 = vmatprep.subr.bf16.mxu1 %v4061_v5  ;;  %v4069_v13 = vld [vmem:[#allocation6 + $0xe0] sm:$0xff]   ;;  %v4073_v17 = vld [vmem:[#allocation6 + $0xd8] sm:$0xff]   ;;  %v4076_v20 = vld [vmem:[#allocation6 + $0x50] sm:$0xff]   ;;  %p4419_p11 = scmp.ne.s32.totalorder %s5449_s28, %s4418_s23  ;;  %s4531_s7 = smov [#allocation15]  }
  0xa0   : > { %v4070_v14 = vld [vmem:[#allocation6 + $0x20] sm:$0xff]   ;;  %v4074_v18 = vld [vmem:[#allocation6 + $0x18] sm:$0xff]   ;;  %v4077_v21 = vld [vmem:[#allocation6 + $0xd0] sm:$0xff]  }
  0xa1   : > { %3423 = vmatpush3.bf16.msra.mxu0 %v4062_v6  ;;  %v4071_v15 = vld [vmem:[#allocation6 + $0xa0] sm:$0xff]   ;;  %v4075_v19 = vld [vmem:[#allocation6 + $0x98] sm:$0xff]   ;;  %v4078_v22 = vld [vmem:[#allocation6 + $0x10] sm:$0xff]   ;;  %p4420_p1 = pnand %p4419_p11, %p4697_p12 }
  0xa2   : > { %3535 = vmatpush3.bf16.msra.mxu1 %v4063_v7  ;;  %3424 = vmatprep.subr.bf16.mxu0 %v4064_v8  ;;  %v4079_v23 = vld [vmem:[#allocation6 + $0x90] sm:$0xff]   ;;  %v4080_v24 = vld [vmem:[#allocation6 + $0x48] sm:$0xff]   ;;  %v4084_v28 = vld [vmem:[#allocation6 + $0x40] sm:$0xff]  }
  0xa3   : > { %3536 = vmatprep.subr.bf16.mxu1 %v4065_v9  ;;  %v4081_v25 = vld [vmem:[#allocation6 + $0xc8] sm:$0xff]   ;;  %v4085_v29 = vld [vmem:[#allocation6 + $0xc0] sm:$0xff]   ;;  %v4094_v36 = vld [vmem:[#allocation9 + $0x38] sm:$0xff]   ;;  %p4421_p5 = pneg %p4420_p1 }
  0xa4   : > { %v4082_v26 = vld [vmem:[#allocation6 + $0x8] sm:$0xff]   ;;  %v4086_v30 = vld [vmem:[#allocation6] sm:$0xff]   ;;  %v4107_v42 = vld [vmem:[#allocation9 + $0x30] sm:$0xff]  }
  0xa5   : > { %3425 = vmatpush3.bf16.msra.mxu0 %v4066_v10  ;;  %v4083_v27 = vld [vmem:[#allocation6 + $0x88] sm:$0xff]   ;;  %v4087_v31 = vld [vmem:[#allocation6 + $0x80] sm:$0xff]   ;;  %v4146_v54 = vld [vmem:[#allocation9 + $0x18] sm:$0xff]  }
  0xa6   : > { %3537 = vmatpush3.bf16.msra.mxu1 %v4067_v11  ;;  %3426 = vmatprep.subr.bf16.mxu0 %v4068_v12  ;;  %v4088_v32 = vld [vmem:[%s4784_s21] ss:$16 sps:$4 sm:$0xff]   ;;  %v4090_v33 = vld [vmem:[%s4784_s21 + $0x4] ss:$16 sps:$4 sm:$0xff]   ;;  %v4091_v34 = vld [vmem:[%s4784_s21 + $0x8] ss:$16 sps:$4 sm:$0xff]  }
  0xa7   : > { %3538 = vmatprep.subr.bf16.mxu1 %v4069_v13  ;;  %v4093_v35 = vld [vmem:[%s4784_s21 + $0xc] ss:$16 sps:$4 sm:$0xff]   ;;  %1313 = vmatprep.mubr.bf16.mxu0 %v4090_v33  ;;  %v4095_v37 = vld [vmem:[%s4784_s21 + $0x24] ss:$16 sps:$4 sm:$0xff]   ;;  %v4099_v39 = vld [vmem:[%s4784_s21 + $0x20] ss:$16 sps:$4 sm:$0xff]  }
  0xa8   : > { %1474 = vmatprep.mubr.bf16.mxu1 %v4093_v35  ;;  %v4097_v38 = vld [vmem:[%s4784_s21 + $0x2c] ss:$16 sps:$4 sm:$0xff]   ;;  %v4100_v40 = vld [vmem:[%s4784_s21 + $0x28] ss:$16 sps:$4 sm:$0xff]   ;;  %v4101_v41 = vld [vmem:[%s4784_s21 + $0x44] ss:$16 sps:$4 sm:$0xff]  }
  0xa9   : > { %3427 = vmatpush3.bf16.msra.mxu0 %v4070_v14  ;;  %v4103_v43 = vld [vmem:[%s4784_s21 + $0x4c] ss:$16 sps:$4 sm:$0xff]   ;;  %v4105_v44 = vld [vmem:[%s4784_s21 + $0x40] ss:$16 sps:$4 sm:$0xff]   ;;  %v4106_v45 = vld [vmem:[%s4784_s21 + $0x48] ss:$16 sps:$4 sm:$0xff]  }
  0xaa   : > { %3539 = vmatpush3.bf16.msra.mxu1 %v4071_v15  ;;  %3428 = vmatprep.subr.bf16.mxu0 %v4072_v16  ;;  %v4120_v46 = vld [vmem:[#allocation9 + $0x28] sm:$0xff]   ;;  %v4108_v47 = vld [vmem:[%s4784_s21 + $0x64] ss:$16 sps:$4 sm:$0xff]   ;;  %v4112_v50 = vld [vmem:[%s4784_s21 + $0x60] ss:$16 sps:$4 sm:$0xff]  }
  0xab   : > { %3540 = vmatprep.subr.bf16.mxu1 %v4073_v17  ;;  %v4110_v48 = vld [vmem:[%s4784_s21 + $0x6c] ss:$16 sps:$4 sm:$0xff]   ;;  %v4133_v49 = vld [vmem:[#allocation9 + $0x20] sm:$0xff]   ;;  %v4113_v51 = vld [vmem:[%s4784_s21 + $0x68] ss:$16 sps:$4 sm:$0xff]  }
  0xac   : > { %v4114_v52 = vld [vmem:[%s4784_s21 + $0x84] ss:$16 sps:$4 sm:$0xff]   ;;  %v4116_v53 = vld [vmem:[%s4784_s21 + $0x8c] ss:$16 sps:$4 sm:$0xff]   ;;  %v4118_v55 = vld [vmem:[%s4784_s21 + $0x80] ss:$16 sps:$4 sm:$0xff]  }
  0xad   : > { %3429 = vmatpush3.bf16.msra.mxu0 %v4074_v18  ;;  %v4119_v56 = vld [vmem:[%s4784_s21 + $0x88] ss:$16 sps:$4 sm:$0xff]   ;;  %v4121_v57 = vld [vmem:[%s4784_s21 + $0xa4] ss:$16 sps:$4 sm:$0xff]   ;;  %v4123_v58 = vld [vmem:[%s4784_s21 + $0xac] ss:$16 sps:$4 sm:$0xff]  }
  0xae   : > { %3541 = vmatpush3.bf16.msra.mxu1 %v4075_v19  ;;  %3430 = vmatprep.subr.bf16.mxu0 %v4076_v20  ;;  %v4159_v59 = vld [vmem:[#allocation9 + $0x10] sm:$0xff]   ;;  %v4126_v61 = vld [vmem:[%s4784_s21 + $0xa8] ss:$16 sps:$4 sm:$0xff]   ;;  %v4129_v0 = vld [vmem:[%s4784_s21 + $0xcc] ss:$16 sps:$4 sm:$0xff]  }
  0xaf   : > { %3542 = vmatprep.subr.bf16.mxu1 %v4077_v21  ;;  %v4125_v60 = vld [vmem:[%s4784_s21 + $0xa0] ss:$16 sps:$4 sm:$0xff]   ;;  %v4127_v62 = vld [vmem:[%s4784_s21 + $0xc4] ss:$16 sps:$4 sm:$0xff]   ;;  %v4172_v63 = vld [vmem:[#allocation9 + $0x8] sm:$0xff]  }
  0xb0   : > { %v4131_v1 = vld [vmem:[%s4784_s21 + $0xc0] ss:$16 sps:$4 sm:$0xff]   ;;  %v4132_v3 = vld [vmem:[%s4784_s21 + $0xc8] ss:$16 sps:$4 sm:$0xff]   ;;  %v4134_v4 = vld [vmem:[%s4784_s21 + $0xe4] ss:$16 sps:$4 sm:$0xff]  }
  0xb1   : > { %3431 = vmatpush3.bf16.msra.mxu0 %v4078_v22  ;;  %v4185_v2 = vld [vmem:[#allocation9] sm:$0xff]   ;;  %v4136_v5 = vld [vmem:[%s4784_s21 + $0xec] ss:$16 sps:$4 sm:$0xff]   ;;  %v4139_v8 = vld [vmem:[%s4784_s21 + $0xe8] ss:$16 sps:$4 sm:$0xff]  }
  0xb2   : > { %3543 = vmatpush3.bf16.msra.mxu1 %v4079_v23  ;;  %3432 = vmatprep.subr.bf16.mxu0 %v4080_v24  ;;  %v4138_v6 = vld [vmem:[%s4784_s21 + $0xe0] ss:$16 sps:$4 sm:$0xff]   ;;  %v4196_v7 = vld [vmem:[#allocation10 + $0x38] sm:$0xff]   ;;  %v4140_v9 = vld [vmem:[%s4784_s21 + $0x104] ss:$16 sps:$4 sm:$0xff]  }
  0xb3   : > { %3544 = vmatprep.subr.bf16.mxu1 %v4081_v25  ;;  %v4142_v10 = vld [vmem:[%s4784_s21 + $0x10c] ss:$16 sps:$4 sm:$0xff]   ;;  %v4201_v11 = vld [vmem:[#allocation10 + $0x30] sm:$0xff]   ;;  %v4145_v13 = vld [vmem:[%s4784_s21 + $0x108] ss:$16 sps:$4 sm:$0xff]  }
  0xb4   : > { %v4144_v12 = vld [vmem:[%s4784_s21 + $0x100] ss:$16 sps:$4 sm:$0xff]   ;;  %v4147_v14 = vld [vmem:[%s4784_s21 + $0x124] ss:$16 sps:$4 sm:$0xff]   ;;  %v4206_v15 = vld [vmem:[#allocation10 + $0x28] sm:$0xff]  }
  0xb5   : > { %3433 = vmatpush3.bf16.msra.mxu0 %v4082_v26  ;;  %v4149_v16 = vld [vmem:[%s4784_s21 + $0x12c] ss:$16 sps:$4 sm:$0xff]   ;;  %v4151_v17 = vld [vmem:[%s4784_s21 + $0x120] ss:$16 sps:$4 sm:$0xff]   ;;  %v4152_v19 = vld [vmem:[%s4784_s21 + $0x128] ss:$16 sps:$4 sm:$0xff]  }
  0xb6   : > { %3545 = vmatpush3.bf16.msra.mxu1 %v4083_v27  ;;  %3434 = vmatprep.subr.bf16.mxu0 %v4084_v28  ;;  %v4211_v18 = vld [vmem:[#allocation10 + $0x20] sm:$0xff]   ;;  %v4155_v21 = vld [vmem:[%s4784_s21 + $0x14c] ss:$16 sps:$4 sm:$0xff]   ;;  %v4213_v24 = vld [vmem:[#allocation10 + $0x10] sm:$0xff]  }
  0xb7   : > { %3546 = vmatprep.subr.bf16.mxu1 %v4085_v29  ;;  %v4153_v20 = vld [vmem:[%s4784_s21 + $0x144] ss:$16 sps:$4 sm:$0xff]   ;;  %v4212_v22 = vld [vmem:[#allocation10 + $0x18] sm:$0xff]   ;;  %v4157_v23 = vld [vmem:[%s4784_s21 + $0x140] ss:$16 sps:$4 sm:$0xff]  }
  0xb8   : > { %v4158_v25 = vld [vmem:[%s4784_s21 + $0x148] ss:$16 sps:$4 sm:$0xff]   ;;  %v4160_v26 = vld [vmem:[%s4784_s21 + $0x164] ss:$16 sps:$4 sm:$0xff]   ;;  %v4162_v27 = vld [vmem:[%s4784_s21 + $0x16c] ss:$16 sps:$4 sm:$0xff]  }
  0xb9   : > { %3435 = vmatpush3.bf16.msra.mxu0 %v4086_v30  ;;  %v4214_v28 = vld [vmem:[#allocation10 + $0x8] sm:$0xff]   ;;  %v4215_v29 = vld [vmem:[#allocation10] sm:$0xff]  }
  0xba   : > { %3547 = vmatpush3.bf16.msra.mxu1 %v4087_v31  ;;  %3740 = vmatprep.subr.bf16.mxu0 %v4196_v7  ;;  %v4164_v30 = vld [vmem:[%s4784_s21 + $0x160] ss:$16 sps:$4 sm:$0xff]   ;;  %v4165_v31 = vld [vmem:[%s4784_s21 + $0x168] ss:$16 sps:$4 sm:$0xff]   ;;  %v4168_v33 = vld [vmem:[%s4784_s21 + $0x18c] ss:$16 sps:$4 sm:$0xff]  }
  0xbb   : > { %3788 = vmatprep.subr.bf16.mxu1 %v4094_v36  ;;  %v4171_v35 = vld [vmem:[%s4784_s21 + $0x188] ss:$16 sps:$4 sm:$0xff]  }
  0xbc   : > { %1314 = vmatmul.mubr.bf16.vlgmr.msra.gmra.mxu0 %v4088_v32  ;;  %v4166_v32 = vld [vmem:[%s4784_s21 + $0x184] ss:$16 sps:$4 sm:$0xff]  }
  0xbd   : > { %1475 = vmatmul.mubr.bf16.vlgmr.msra.gmra.mxu1 %v4091_v34  ;;  %1321 = vmatprep.mubr.bf16.mxu0 %v4095_v37  ;;  %v4170_v34 = vld [vmem:[%s4784_s21 + $0x180] ss:$16 sps:$4 sm:$0xff]   ;;  %v4175_v37 = vld [vmem:[%s4784_s21 + $0x1ac] ss:$16 sps:$4 sm:$0xff]  }
  0xbe   : > { %3789 = vmatpush3.bf16.msra.mxu1 %v4094_v36  ;;  %1482 = vmatprep.mubr.bf16.mxu1 %v4097_v38  ;;  %v4173_v36 = vld [vmem:[%s4784_s21 + $0x1a4] ss:$16 sps:$4 sm:$0xff]   ;;  %v4177_v38 = vld [vmem:[%s4784_s21 + $0x1a0] ss:$16 sps:$4 sm:$0xff]  }
  0xbf   : > { %3790 = vmatprep.subr.bf16.mxu1 %v4107_v42  ;;  %3741 = vmatpush3.bf16.msra.mxu0 %v4196_v7 }
  0xc0   : > { %3742 = vmatprep.subr.bf16.mxu0 %v4201_v11 }
  0xc2   : > { %3791 = vmatpush3.bf16.msra.mxu1 %v4107_v42  ;;  %v4183_v42 = vld [vmem:[%s4784_s21 + $0x1c0] ss:$16 sps:$4 sm:$0xff]  }
  0xc3   : > { %3792 = vmatprep.subr.bf16.mxu1 %v4120_v46  ;;  %3743 = vmatpush3.bf16.msra.mxu0 %v4201_v11 }
  0xc4   : > { %1322 = vmatmul.mubr.bf16.gmra.mxu0 %v4099_v39  ;;  %3744 = vmatprep.subr.bf16.mxu0 %v4206_v15  ;;  %v4178_v39 = vld [vmem:[%s4784_s21 + $0x1a8] ss:$16 sps:$4 sm:$0xff]  }
  0xc5   : > { %1483 = vmatmul.mubr.bf16.gmra.mxu1 %v4100_v40  ;;  %1329 = vmatprep.mubr.bf16.mxu0 %v4101_v41  ;;  %v4179_v40 = vld [vmem:[%s4784_s21 + $0x1c4] ss:$16 sps:$4 sm:$0xff]   ;;  %v4181_v41 = vld [vmem:[%s4784_s21 + $0x1cc] ss:$16 sps:$4 sm:$0xff]  }
  0xc6   : > { %1490 = vmatprep.mubr.bf16.mxu1 %v4103_v43  ;;  %3793 = vmatpush3.bf16.msra.mxu1 %v4120_v46  ;;  %v4184_v43 = vld [vmem:[%s4784_s21 + $0x1c8] ss:$16 sps:$4 sm:$0xff]   ;;  %v4190_v46 = vld [vmem:[%s4784_s21 + $0x1e0] ss:$16 sps:$4 sm:$0xff]  }
  0xc7   : > { %3794 = vmatprep.subr.bf16.mxu1 %v4133_v49  ;;  %3745 = vmatpush3.bf16.msra.mxu0 %v4206_v15  ;;  %v4899_v15 = vld [vmem:[%s5502_s2] ss:$0 sm:$0xff] }
  0xc8   : > { %3746 = vmatprep.subr.bf16.mxu0 %v4211_v18 }
  0xca   : > { %3795 = vmatpush3.bf16.msra.mxu1 %v4133_v49  ;;  %v4193_v49 = vld [vmem:[%s4795_s18 + $0x8] sm:$0xff]  }
  0xcb   : > { %3796 = vmatprep.subr.bf16.mxu1 %v4146_v54  ;;  %3747 = vmatpush3.bf16.msra.mxu0 %v4211_v18 }
  0xcc   : > { %1330 = vmatmul.mubr.bf16.gmra.mxu0 %v4105_v44  ;;  %3748 = vmatprep.subr.bf16.mxu0 %v4212_v22  ;;  %v4186_v44 = vld [vmem:[%s4784_s21 + $0x1e4] ss:$16 sps:$4 sm:$0xff]  }
  0xcd   : > { %1491 = vmatmul.mubr.bf16.gmra.mxu1 %v4106_v45  ;;  %1337 = vmatprep.mubr.bf16.mxu0 %v4108_v47  ;;  %v4188_v45 = vld [vmem:[%s4784_s21 + $0x1ec] ss:$16 sps:$4 sm:$0xff]   ;;  %v4191_v47 = vld [vmem:[%s4784_s21 + $0x1e8] ss:$16 sps:$4 sm:$0xff]   ;;  %s3419_s21 = sshll.u32 %s5651_s29, 12 }
  0xce   : > { %1498 = vmatprep.mubr.bf16.mxu1 %v4110_v48  ;;  %3797 = vmatpush3.bf16.msra.mxu1 %v4146_v54  ;;  %v4192_v48 = vld [vmem:[%s4795_s18] sm:$0xff]   ;;  %v4199_v54 = vld [vmem:[%s4795_s18 + $0x30] sm:$0xff]   ;;  %s5447_s30 = scalar_lea.hbm %s5652_s14, %s3419_s21 }
  0xcf   : > { %3798 = vmatprep.subr.bf16.mxu1 %v4159_v59  ;;  %3749 = vmatpush3.bf16.msra.mxu0 %v4212_v22 }
  0xd0   : > { %3750 = vmatprep.subr.bf16.mxu0 %v4213_v24 }
  0xd2   : > { %3799 = vmatpush3.bf16.msra.mxu1 %v4159_v59  ;;  %v4204_v59 = vld [vmem:[%s4795_s18 + $0x50] sm:$0xff]  }
  0xd3   : > { %3800 = vmatprep.subr.bf16.mxu1 %v4172_v63  ;;  %3751 = vmatpush3.bf16.msra.mxu0 %v4213_v24 }
  0xd4   : > { %1338 = vmatmul.mubr.bf16.gmra.mxu0 %v4112_v50  ;;  %3752 = vmatprep.subr.bf16.mxu0 %v4214_v28  ;;  %v4194_v50 = vld [vmem:[%s4795_s18 + $0x10] sm:$0xff]  }
  0xd5   : > { %1499 = vmatmul.mubr.bf16.gmra.mxu1 %v4113_v51  ;;  %1345 = vmatprep.mubr.bf16.mxu0 %v4114_v52  ;;  %v4195_v51 = vld [vmem:[%s4795_s18 + $0x18] sm:$0xff]   ;;  %v4197_v52 = vld [vmem:[%s4795_s18 + $0x20] sm:$0xff]  }
  0xd6   : > { %1506 = vmatprep.mubr.bf16.mxu1 %v4116_v53  ;;  %3801 = vmatpush3.bf16.msra.mxu1 %v4172_v63  ;;  %v4198_v53 = vld [vmem:[%s4795_s18 + $0x28] sm:$0xff]   ;;  %v4209_v63 = vld [vmem:[%s4795_s18 + $0x70] sm:$0xff]  }
  0xd7   : > { %3802 = vmatprep.subr.bf16.mxu1 %v4185_v2  ;;  %3753 = vmatpush3.bf16.msra.mxu0 %v4214_v28 }
  0xd8   : > { %3754 = vmatprep.subr.bf16.mxu0 %v4215_v29 }
  0xda   : > { %3803 = vmatpush3.bf16.msra.mxu1 %v4185_v2 }
  0xdb   : > { %3755 = vmatpush3.bf16.msra.mxu0 %v4215_v29 }
  0xdc   : > { %1346 = vmatmul.mubr.bf16.gmra.mxu0 %v4118_v55  ;;  %v4884_v55 = vld [vmem:[#allocation12 + $0x38] sm:$0xff]  }
  0xdd   : > { %1507 = vmatmul.mubr.bf16.gmra.mxu1 %v4119_v56  ;;  %1353 = vmatprep.mubr.bf16.mxu0 %v4121_v57  ;;  %v4200_v56 = vld [vmem:[%s4795_s18 + $0x38] sm:$0xff]   ;;  %v4202_v57 = vld [vmem:[%s4795_s18 + $0x40] sm:$0xff]  }
  0xde   : > { %1514 = vmatprep.mubr.bf16.mxu1 %v4123_v58  ;;  %3836 = vmatprep.subr.bf16.mxu0 %v4884_v55  ;;  %v4203_v58 = vld [vmem:[%s4795_s18 + $0x48] sm:$0xff]  }
  0xe4   : > { %1354 = vmatmul.mubr.bf16.gmra.mxu0 %v4125_v60  ;;  %v4205_v60 = vld [vmem:[%s4795_s18 + $0x58] sm:$0xff]  }
  0xe5   : > { %1515 = vmatmul.mubr.bf16.gmra.mxu1 %v4126_v61  ;;  %1361 = vmatprep.mubr.bf16.mxu0 %v4127_v62  ;;  %v4207_v61 = vld [vmem:[%s4795_s18 + $0x60] sm:$0xff]   ;;  %v4208_v62 = vld [vmem:[%s4795_s18 + $0x68] sm:$0xff]  }
  0xe6   : > { %1522 = vmatprep.mubr.bf16.mxu1 %v4129_v0  ;;  %v4210_v0 = vld [vmem:[%s4795_s18 + $0x78] sm:$0xff]  }
  0xec   : > { %1362 = vmatmul.mubr.bf16.gmra.mxu0 %v4131_v1 }
  0xed   : > { %1523 = vmatmul.mubr.bf16.gmra.mxu1 %v4132_v3  ;;  %1369 = vmatprep.mubr.bf16.mxu0 %v4134_v4 }
  0xee   : > { %1530 = vmatprep.mubr.bf16.mxu1 %v4136_v5 }
  0xf4   : > { %1370 = vmatmul.mubr.bf16.gmra.mxu0 %v4138_v6 }
  0xf5   : > { %1531 = vmatmul.mubr.bf16.gmra.mxu1 %v4139_v8  ;;  %1377 = vmatprep.mubr.bf16.mxu0 %v4140_v9 }
  0xf6   : > { %1538 = vmatprep.mubr.bf16.mxu1 %v4142_v10 }
  0xfc   : > { %1378 = vmatmul.mubr.bf16.gmra.mxu0 %v4144_v12 }
  0xfd   : > { %1539 = vmatmul.mubr.bf16.gmra.mxu1 %v4145_v13  ;;  %1385 = vmatprep.mubr.bf16.mxu0 %v4147_v14 }
  0xfe   : > { %1546 = vmatprep.mubr.bf16.mxu1 %v4149_v16 }
 0x104   : > { %1386 = vmatmul.mubr.bf16.gmra.mxu0 %v4151_v17 }
 0x105   : > { %1547 = vmatmul.mubr.bf16.gmra.mxu1 %v4152_v19  ;;  %1393 = vmatprep.mubr.bf16.mxu0 %v4153_v20 }
 0x106   : > { %1554 = vmatprep.mubr.bf16.mxu1 %v4155_v21 }
 0x10c   : > { %1394 = vmatmul.mubr.bf16.gmra.mxu0 %v4157_v23 }
 0x10d   : > { %1555 = vmatmul.mubr.bf16.gmra.mxu1 %v4158_v25  ;;  %1401 = vmatprep.mubr.bf16.mxu0 %v4160_v26 }
 0x10e   : > { %1562 = vmatprep.mubr.bf16.mxu1 %v4162_v27 }
 0x114   : > { %1402 = vmatmul.mubr.bf16.gmra.mxu0 %v4164_v30 }
 0x115   : > { %1563 = vmatmul.mubr.bf16.gmra.mxu1 %v4165_v31  ;;  %1409 = vmatprep.mubr.bf16.mxu0 %v4166_v32 }
 0x116   : > { %1570 = vmatprep.mubr.bf16.mxu1 %v4168_v33 }
 0x11c   : > { %1410 = vmatmul.mubr.bf16.gmra.mxu0 %v4170_v34 }
 0x11d   : > { %1571 = vmatmul.mubr.bf16.gmra.mxu1 %v4171_v35  ;;  %1417 = vmatprep.mubr.bf16.mxu0 %v4173_v36 }
 0x11e   : > { %1578 = vmatprep.mubr.bf16.mxu1 %v4175_v37 }
 0x124   : > { %1418 = vmatmul.mubr.bf16.gmra.mxu0 %v4177_v38 }
 0x125   : > { %1579 = vmatmul.mubr.bf16.gmra.mxu1 %v4178_v39  ;;  %1425 = vmatprep.mubr.bf16.mxu0 %v4179_v40 }
 0x126   : > { %1586 = vmatprep.mubr.bf16.mxu1 %v4181_v41 }
 0x12c   : > { %1426 = vmatmul.mubr.bf16.gmra.mxu0 %v4183_v42 }
 0x12d   : > { %1587 = vmatmul.mubr.bf16.gmra.mxu1 %v4184_v43  ;;  %1433 = vmatprep.mubr.bf16.mxu0 %v4186_v44 }
 0x12e   : > { %1594 = vmatprep.mubr.bf16.mxu1 %v4188_v45  ;;  %v4217_v45 = vld [vmem:[#allocation12 + $0x30] sm:$0xff]  }
 0x134   : > { %1434 = vmatmul.mubr.bf16.gmra.mxu0 %v4190_v46 }
 0x135   : > { %1595 = vmatmul.mubr.bf16.gmra.mxu1 %v4191_v47 }
 0x136   : > { %3804 = vmatprep.mubr.bf16.mxu1 %v4192_v48 }
 0x13d   : > { %3805 = vmatmul.mubr.bf16.vlgmr.msra.gmra.mxu1 %v4193_v49 }
 0x13e   : > { %3808 = vmatprep.mubr.bf16.mxu1 %v4194_v50 }
 0x145   : > { %3809 = vmatmul.mubr.bf16.gmra.mxu1 %v4195_v51 }
 0x146   : > { %3812 = vmatprep.mubr.bf16.mxu1 %v4197_v52 }
 0x14d   : > { %3813 = vmatmul.mubr.bf16.gmra.mxu1 %v4198_v53 }
 0x14e   : > { %3816 = vmatprep.mubr.bf16.mxu1 %v4199_v54  ;;  %v4218_v54 = vld [vmem:[#allocation12 + $0x28] sm:$0xff]  }
 0x155   : > { %3817 = vmatmul.mubr.bf16.gmra.mxu1 %v4200_v56 }
 0x156   : > { %3820 = vmatprep.mubr.bf16.mxu1 %v4202_v57 }
 0x15d   : > { %3821 = vmatmul.mubr.bf16.gmra.mxu1 %v4203_v58 }
 0x15e   : > { %3824 = vmatprep.mubr.bf16.mxu1 %v4204_v59 }
 0x165   : > { %3825 = vmatmul.mubr.bf16.gmra.mxu1 %v4205_v60 }
 0x166   : > { %3828 = vmatprep.mubr.bf16.mxu1 %v4207_v61 }
 0x16d   : > { %3829 = vmatmul.mubr.bf16.gmra.mxu1 %v4208_v62 }
 0x16e   : > { %3832 = vmatprep.mubr.bf16.mxu1 %v4209_v63 }
 0x175   : > { %3833 = vmatmul.mubr.bf16.gmra.mxu1 %v4210_v0  ;;  %v4219_v0 = vld [vmem:[#allocation12 + $0x20] sm:$0xff]  }
 0x17c   : > { %v3436_v1 = vpop.f32.mrf.mxu0 }
 0x17d   : > { %v3548_v2 = vpop.f32.mrf.mxu1 }
 0x17e   : > { %v3437_v3 = vpop.f32.mrf.mxu0 }
 0x17f   : > { %v3549_v4 = vpop.f32.mrf.mxu1  ;;  %v3438_v5 = vadd.f32 %v3437_v3, %v3436_v1 }
 0x180   : > { %v3550_v6 = vadd.f32 %v3549_v4, %v3548_v2  ;;  %v3439_v7 = vpop.f32.mrf.mxu0 }
 0x181   : > { %v3551_v8 = vpop.f32.mrf.mxu1 }
 0x182   : > { %v3440_v9 = vpop.f32.mrf.mxu0  ;;  %v1477_v12 = vadd.f32 %v3550_v6, %v3438_v5 }
 0x183   : > { %v3441_v10 = vadd.f32 %v3440_v9, %v3439_v7  ;;  %v3552_v11 = vpop.f32.mrf.mxu1  ;;  %v4220_v9 = vld [vmem:[#allocation12 + $0x18] sm:$0xff]  }
 0x184   : > { %v3553_v13 = vadd.f32 %v3552_v11, %v3551_v8  ;;  %v3442_v14 = vpop.f32.mrf.mxu0  ;;  %v4902_v20 = vadd.f32 %v4899_v15, %v1477_v12 }
 0x185   : > { %v3554_v16 = vpop.f32.mrf.mxu1 }
 0x186   : > { %v1480_v17 = vadd.f32 %v3553_v13, %v3441_v10  ;;  %v3443_v18 = vpop.f32.mrf.mxu0 }
 0x187   : > { %v3555_v19 = vpop.f32.mrf.mxu1  ;;  %v3444_v22 = vadd.f32 %v3443_v18, %v3442_v14 }
 0x188   : > { %v4905_v21 = vadd.f32 %v4899_v15, %v1480_v17  ;;  %v3556_v23 = vadd.f32 %v3555_v19, %v3554_v16  ;;  %v3445_v24 = vpop.f32.mrf.mxu0 }
 0x189   : > { %v3557_v25 = vpop.f32.mrf.mxu1 }
 0x18a   : > { %v3446_v26 = vpop.f32.mrf.mxu0  ;;  %v1780_v27 = vpack.c.bf16 %v4905_v21, %v4902_v20  ;;  %v1485_v30 = vadd.f32 %v3556_v23, %v3444_v22  ;;  %v4221_v22 = vld [vmem:[#allocation12 + $0x10] sm:$0xff]  }
 0x18b   : > { %v3447_v28 = vadd.f32 %v3446_v26, %v3445_v24  ;;  %v3558_v29 = vpop.f32.mrf.mxu1 }
 0x18c   : > { %v3559_v31 = vadd.f32 %v3558_v29, %v3557_v25  ;;  %3756 = vmatprep.mubr.bf16.mxu0 %v1780_v27  ;;  %v3448_v32 = vpop.f32.mrf.mxu0  ;;  %v4910_v37 = vadd.f32 %v4899_v15, %v1485_v30 }
 0x18d   : > { %v3560_v33 = vpop.f32.mrf.mxu1 }
 0x18e   : > { %v1488_v34 = vadd.f32 %v3559_v31, %v3447_v28  ;;  %v3449_v35 = vpop.f32.mrf.mxu0  ;;  %v4222_v31 = vld [vmem:[#allocation12 + $0x8] sm:$0xff]  }
 0x18f   : > { %v3561_v36 = vpop.f32.mrf.mxu1  ;;  %v3450_v39 = vadd.f32 %v3449_v35, %v3448_v32 }
 0x190   : > { %v4913_v38 = vadd.f32 %v4899_v15, %v1488_v34  ;;  %v3562_v40 = vadd.f32 %v3561_v36, %v3560_v33  ;;  %v3451_v41 = vpop.f32.mrf.mxu0 }
 0x191   : > { %v3563_v42 = vpop.f32.mrf.mxu1 }
 0x192   : > { %v1781_v43 = vpack.c.bf16 %v4913_v38, %v4910_v37  ;;  %v3452_v44 = vpop.f32.mrf.mxu0  ;;  %v1493_v48 = vadd.f32 %v3562_v40, %v3450_v39 }
 0x193   : > { %v3453_v46 = vadd.f32 %v3452_v44, %v3451_v41  ;;  %v3564_v47 = vpop.f32.mrf.mxu1 }
 0x194   : > { %v3565_v49 = vadd.f32 %v3564_v47, %v3563_v42  ;;  %3757 = vmatmul.mubr.bf16.vlgmr.msra.gmra.mxu0 %v1781_v43  ;;  %v3454_v50 = vpop.f32.mrf.mxu0  ;;  %v4919_v57 = vadd.f32 %v4899_v15, %v1493_v48  ;;  %v4223_v43 = vld [vmem:[#allocation12] sm:$0xff]  }
 0x195   : > { %v3566_v51 = vpop.f32.mrf.mxu1  ;;  %3837 = vmatpush3.bf16.msra.mxu0 %v4884_v55 }
 0x196   : > { %v1496_v52 = vadd.f32 %v3565_v49, %v3453_v46  ;;  %v3455_v53 = vpop.f32.mrf.mxu0  ;;  %3838 = vmatprep.subr.bf16.mxu0 %v4217_v45 }
 0x197   : > { %v3567_v56 = vpop.f32.mrf.mxu1  ;;  %v3456_v59 = vadd.f32 %v3455_v53, %v3454_v50 }
 0x198   : > { %v4922_v58 = vadd.f32 %v4899_v15, %v1496_v52  ;;  %v3568_v60 = vadd.f32 %v3567_v56, %v3566_v51  ;;  %v3457_v61 = vpop.f32.mrf.mxu0 }
 0x199   : > { %v3569_v62 = vpop.f32.mrf.mxu1  ;;  %3839 = vmatpush3.bf16.msra.mxu0 %v4217_v45 }
 0x19a   : > { %v3458_v63 = vpop.f32.mrf.mxu0  ;;  %v1782_v55 = vpack.c.bf16 %v4922_v58, %v4919_v57  ;;  %3840 = vmatprep.subr.bf16.mxu0 %v4218_v54  ;;  %v1501_v3 = vadd.f32 %v3568_v60, %v3456_v59 }
 0x19b   : > { %v3459_v1 = vadd.f32 %v3458_v63, %v3457_v61  ;;  %v3570_v2 = vpop.f32.mrf.mxu1 }
 0x19c   : > { %v3571_v4 = vadd.f32 %v3570_v2, %v3569_v62  ;;  %3760 = vmatprep.mubr.bf16.mxu0 %v1782_v55  ;;  %v3460_v5 = vpop.f32.mrf.mxu0  ;;  %v4927_v11 = vadd.f32 %v4899_v15, %v1501_v3 }
 0x19d   : > { %v3572_v6 = vpop.f32.mrf.mxu1  ;;  %3841 = vmatpush3.bf16.msra.mxu0 %v4218_v54 }
 0x19e   : > { %v1504_v7 = vadd.f32 %v3571_v4, %v3459_v1  ;;  %v3461_v8 = vpop.f32.mrf.mxu0  ;;  %3842 = vmatprep.subr.bf16.mxu0 %v4219_v0 }
 0x19f   : > { %v3573_v10 = vpop.f32.mrf.mxu1  ;;  %v3462_v13 = vadd.f32 %v3461_v8, %v3460_v5 }
 0x1a0   : > { %v4930_v12 = vadd.f32 %v4899_v15, %v1504_v7  ;;  %v3574_v14 = vadd.f32 %v3573_v10, %v3572_v6  ;;  %v3463_v16 = vpop.f32.mrf.mxu0 }
 0x1a1   : > { %v3575_v17 = vpop.f32.mrf.mxu1  ;;  %3843 = vmatpush3.bf16.msra.mxu0 %v4219_v0 }
 0x1a2   : > { %v3464_v18 = vpop.f32.mrf.mxu0  ;;  %v1783_v19 = vpack.c.bf16 %v4930_v12, %v4927_v11  ;;  %3844 = vmatprep.subr.bf16.mxu0 %v4220_v9  ;;  %v1509_v25 = vadd.f32 %v3574_v14, %v3462_v13 }
 0x1a3   : > { %v3465_v23 = vadd.f32 %v3464_v18, %v3463_v16  ;;  %v3576_v24 = vpop.f32.mrf.mxu1 }
 0x1a4   : > { %v3577_v26 = vadd.f32 %v3576_v24, %v3575_v17  ;;  %3761 = vmatmul.mubr.bf16.gmra.mxu0 %v1783_v19  ;;  %v3466_v27 = vpop.f32.mrf.mxu0  ;;  %v4935_v33 = vadd.f32 %v4899_v15, %v1509_v25 }
 0x1a5   : > { %v3578_v28 = vpop.f32.mrf.mxu1  ;;  %3845 = vmatpush3.bf16.msra.mxu0 %v4220_v9 }
 0x1a6   : > { %v1512_v29 = vadd.f32 %v3577_v26, %v3465_v23  ;;  %v3467_v30 = vpop.f32.mrf.mxu0  ;;  %3846 = vmatprep.subr.bf16.mxu0 %v4221_v22 }
 0x1a7   : > { %v3579_v32 = vpop.f32.mrf.mxu1  ;;  %v3468_v35 = vadd.f32 %v3467_v30, %v3466_v27 }
 0x1a8   : > { %v4938_v34 = vadd.f32 %v4899_v15, %v1512_v29  ;;  %v3580_v36 = vadd.f32 %v3579_v32, %v3578_v28  ;;  %v3469_v39 = vpop.f32.mrf.mxu0 }
 0x1a9   : > { %v3581_v40 = vpop.f32.mrf.mxu1  ;;  %3847 = vmatpush3.bf16.msra.mxu0 %v4221_v22 }
 0x1aa   : > { %v3470_v41 = vpop.f32.mrf.mxu0  ;;  %v1784_v42 = vpack.c.bf16 %v4938_v34, %v4935_v33  ;;  %3848 = vmatprep.subr.bf16.mxu0 %v4222_v31  ;;  %v1517_v46 = vadd.f32 %v3580_v36, %v3468_v35 }
 0x1ab   : > { %v3471_v44 = vadd.f32 %v3470_v41, %v3469_v39  ;;  %v3582_v45 = vpop.f32.mrf.mxu1 }
 0x1ac   : > { %v3583_v47 = vadd.f32 %v3582_v45, %v3581_v40  ;;  %3764 = vmatprep.mubr.bf16.mxu0 %v1784_v42  ;;  %v3472_v48 = vpop.f32.mrf.mxu0  ;;  %v4943_v53 = vadd.f32 %v4899_v15, %v1517_v46 }
 0x1ad   : > { %v3584_v49 = vpop.f32.mrf.mxu1  ;;  %3849 = vmatpush3.bf16.msra.mxu0 %v4222_v31 }
 0x1ae   : > { %v1520_v50 = vadd.f32 %v3583_v47, %v3471_v44  ;;  %v3473_v51 = vpop.f32.mrf.mxu0  ;;  %3850 = vmatprep.subr.bf16.mxu0 %v4223_v43 }
 0x1af   : > { %v3585_v52 = vpop.f32.mrf.mxu1  ;;  %v3474_v56 = vadd.f32 %v3473_v51, %v3472_v48 }
 0x1b0   : > { %v4946_v54 = vadd.f32 %v4899_v15, %v1520_v50  ;;  %v3586_v59 = vadd.f32 %v3585_v52, %v3584_v49  ;;  %v3475_v60 = vpop.f32.mrf.mxu0 }
 0x1b1   : > { %v3587_v61 = vpop.f32.mrf.mxu1  ;;  %3851 = vmatpush3.bf16.msra.mxu0 %v4223_v43 }
 0x1b2   : > { %v3476_v62 = vpop.f32.mrf.mxu0  ;;  %v1785_v63 = vpack.c.bf16 %v4946_v54, %v4943_v53  ;;  %v1525_v1 = vadd.f32 %v3586_v59, %v3474_v56 }
 0x1b3   : > { %v3477_v55 = vadd.f32 %v3476_v62, %v3475_v60  ;;  %v3588_v0 = vpop.f32.mrf.mxu1 }
 0x1b4   : > { %v3589_v2 = vadd.f32 %v3588_v0, %v3587_v61  ;;  %3765 = vmatmul.mubr.bf16.gmra.mxu0 %v1785_v63  ;;  %v3478_v3 = vpop.f32.mrf.mxu0  ;;  %v4951_v8 = vadd.f32 %v4899_v15, %v1525_v1 }
 0x1b5   : > { %v3590_v4 = vpop.f32.mrf.mxu1 }
 0x1b6   : > { %v1528_v5 = vadd.f32 %v3589_v2, %v3477_v55  ;;  %v3479_v6 = vpop.f32.mrf.mxu0 }
 0x1b7   : > { %v3591_v7 = vpop.f32.mrf.mxu1  ;;  %v3480_v10 = vadd.f32 %v3479_v6, %v3478_v3 }
 0x1b8   : > { %v4954_v9 = vadd.f32 %v4899_v15, %v1528_v5  ;;  %v3592_v13 = vadd.f32 %v3591_v7, %v3590_v4  ;;  %v3481_v14 = vpop.f32.mrf.mxu0 }
 0x1b9   : > { %v3593_v16 = vpop.f32.mrf.mxu1 }
 0x1ba   : > { %v3482_v17 = vpop.f32.mrf.mxu0  ;;  %v1786_v18 = vpack.c.bf16 %v4954_v9, %v4951_v8  ;;  %v1533_v23 = vadd.f32 %v3592_v13, %v3480_v10 }
 0x1bb   : > { %v3483_v19 = vadd.f32 %v3482_v17, %v3481_v14  ;;  %v3594_v22 = vpop.f32.mrf.mxu1 }
 0x1bc   : > { %v3595_v24 = vadd.f32 %v3594_v22, %v3593_v16  ;;  %3768 = vmatprep.mubr.bf16.mxu0 %v1786_v18  ;;  %v3484_v25 = vpop.f32.mrf.mxu0  ;;  %v4959_v30 = vadd.f32 %v4899_v15, %v1533_v23 }
 0x1bd   : > { %v3596_v26 = vpop.f32.mrf.mxu1 }
 0x1be   : > { %v1536_v27 = vadd.f32 %v3595_v24, %v3483_v19  ;;  %v3485_v28 = vpop.f32.mrf.mxu0 }
 0x1bf   : > { %v3597_v29 = vpop.f32.mrf.mxu1  ;;  %v3486_v32 = vadd.f32 %v3485_v28, %v3484_v25 }
 0x1c0   : > { %v4962_v31 = vadd.f32 %v4899_v15, %v1536_v27  ;;  %v3598_v35 = vadd.f32 %v3597_v29, %v3596_v26  ;;  %v3487_v36 = vpop.f32.mrf.mxu0 }
 0x1c1   : > { %v3599_v39 = vpop.f32.mrf.mxu1 }
 0x1c2   : > { %v3488_v40 = vpop.f32.mrf.mxu0  ;;  %v1787_v41 = vpack.c.bf16 %v4962_v31, %v4959_v30  ;;  %v1541_v44 = vadd.f32 %v3598_v35, %v3486_v32 }
 0x1c3   : > { %v3489_v42 = vadd.f32 %v3488_v40, %v3487_v36  ;;  %v3600_v43 = vpop.f32.mrf.mxu1 }
 0x1c4   : > { %v3601_v45 = vadd.f32 %v3600_v43, %v3599_v39  ;;  %3769 = vmatmul.mubr.bf16.gmra.mxu0 %v1787_v41  ;;  %v3490_v46 = vpop.f32.mrf.mxu0  ;;  %v4967_v51 = vadd.f32 %v4899_v15, %v1541_v44 }
 0x1c5   : > { %v3602_v47 = vpop.f32.mrf.mxu1 }
 0x1c6   : > { %v1544_v48 = vadd.f32 %v3601_v45, %v3489_v42  ;;  %v3491_v49 = vpop.f32.mrf.mxu0 }
 0x1c7   : > { %v3603_v50 = vpop.f32.mrf.mxu1  ;;  %v3492_v56 = vadd.f32 %v3491_v49, %v3490_v46 }
 0x1c8   : > { %v4970_v52 = vadd.f32 %v4899_v15, %v1544_v48  ;;  %v3604_v59 = vadd.f32 %v3603_v50, %v3602_v47  ;;  %v3493_v60 = vpop.f32.mrf.mxu0 }
 0x1c9   : > { %v3605_v61 = vpop.f32.mrf.mxu1 }
 0x1ca   : > { %v3494_v62 = vpop.f32.mrf.mxu0  ;;  %v1788_v63 = vpack.c.bf16 %v4970_v52, %v4967_v51  ;;  %v1549_v1 = vadd.f32 %v3604_v59, %v3492_v56 }
 0x1cb   : > { %v3495_v55 = vadd.f32 %v3494_v62, %v3493_v60  ;;  %v3606_v0 = vpop.f32.mrf.mxu1 }
 0x1cc   : > { %v3607_v2 = vadd.f32 %v3606_v0, %v3605_v61  ;;  %3772 = vmatprep.mubr.bf16.mxu0 %v1788_v63  ;;  %v3496_v3 = vpop.f32.mrf.mxu0  ;;  %v4975_v10 = vadd.f32 %v4899_v15, %v1549_v1 }
 0x1cd   : > { %v3608_v4 = vpop.f32.mrf.mxu1 }
 0x1ce   : > { %v1552_v5 = vadd.f32 %v3607_v2, %v3495_v55  ;;  %v3497_v6 = vpop.f32.mrf.mxu0 }
 0x1cf   : > { %v3609_v7 = vpop.f32.mrf.mxu1  ;;  %v3498_v14 = vadd.f32 %v3497_v6, %v3496_v3 }
 0x1d0   : > { %v4978_v13 = vadd.f32 %v4899_v15, %v1552_v5  ;;  %v3610_v16 = vadd.f32 %v3609_v7, %v3608_v4  ;;  %v3499_v17 = vpop.f32.mrf.mxu0 }
 0x1d1   : > { %v3611_v18 = vpop.f32.mrf.mxu1 }
 0x1d2   : > { %v3500_v19 = vpop.f32.mrf.mxu0  ;;  %v1789_v22 = vpack.c.bf16 %v4978_v13, %v4975_v10  ;;  %v1557_v25 = vadd.f32 %v3610_v16, %v3498_v14 }
 0x1d3   : > { %v3501_v23 = vadd.f32 %v3500_v19, %v3499_v17  ;;  %v3612_v24 = vpop.f32.mrf.mxu1 }
 0x1d4   : > { %v3613_v26 = vadd.f32 %v3612_v24, %v3611_v18  ;;  %3773 = vmatmul.mubr.bf16.gmra.mxu0 %v1789_v22  ;;  %v3502_v27 = vpop.f32.mrf.mxu0  ;;  %v4983_v36 = vadd.f32 %v4899_v15, %v1557_v25 }
 0x1d5   : > { %v3614_v28 = vpop.f32.mrf.mxu1 }
 0x1d6   : > { %v1560_v29 = vadd.f32 %v3613_v26, %v3501_v23  ;;  %v3503_v32 = vpop.f32.mrf.mxu0  ;;  %5580 = vst [vmem:[#allocation28_spill] sm:$0xff] %v4983_v36 }
 0x1d7   : > { %v3615_v35 = vpop.f32.mrf.mxu1  ;;  %v3504_v40 = vadd.f32 %v3503_v32, %v3502_v27 }
 0x1d8   : > { %v4986_v39 = vadd.f32 %v4899_v15, %v1560_v29  ;;  %v3616_v41 = vadd.f32 %v3615_v35, %v3614_v28  ;;  %v3505_v42 = vpop.f32.mrf.mxu0 }
 0x1d9   : > { %v3617_v43 = vpop.f32.mrf.mxu1 }
 0x1da   : > { %5581 = vst [vmem:[#allocation29_spill] sm:$0xff] %v4986_v39  ;;  %v3506_v44 = vpop.f32.mrf.mxu0  ;;  %v1790_v45 = vpack.c.bf16 %v4986_v39, %v4983_v36  ;;  %v1565_v48 = vadd.f32 %v3616_v41, %v3504_v40 }
 0x1db   : > { %v3507_v46 = vadd.f32 %v3506_v44, %v3505_v42  ;;  %v3618_v47 = vpop.f32.mrf.mxu1 }
 0x1dc   : > { %v3619_v49 = vadd.f32 %v3618_v47, %v3617_v43  ;;  %3776 = vmatprep.mubr.bf16.mxu0 %v1790_v45  ;;  %v3508_v50 = vpop.f32.mrf.mxu0  ;;  %v4991_v62 = vadd.f32 %v4899_v15, %v1565_v48 }
 0x1dd   : > { %v3620_v56 = vpop.f32.mrf.mxu1 }
 0x1de   : > { %v1568_v59 = vadd.f32 %v3619_v49, %v3507_v46  ;;  %v3509_v60 = vpop.f32.mrf.mxu0 }
 0x1df   : > { %v3621_v61 = vpop.f32.mrf.mxu1  ;;  %v3510_v55 = vadd.f32 %v3509_v60, %v3508_v50 }
 0x1e0   : > { %v4994_v63 = vadd.f32 %v4899_v15, %v1568_v59  ;;  %v3622_v0 = vadd.f32 %v3621_v61, %v3620_v56  ;;  %v3511_v1 = vpop.f32.mrf.mxu0 }
 0x1e1   : > { %v3623_v2 = vpop.f32.mrf.mxu1 }
 0x1e2   : > { %5582 = vst [vmem:[#allocation30_spill] sm:$0xff] %v4994_v63  ;;  %v3512_v3 = vpop.f32.mrf.mxu0  ;;  %v1791_v4 = vpack.c.bf16 %v4994_v63, %v4991_v62  ;;  %v1573_v7 = vadd.f32 %v3622_v0, %v3510_v55 }
 0x1e3   : > { %v3513_v5 = vadd.f32 %v3512_v3, %v3511_v1  ;;  %v3624_v6 = vpop.f32.mrf.mxu1 }
 0x1e4   : > { %v3625_v14 = vadd.f32 %v3624_v6, %v3623_v2  ;;  %3777 = vmatmul.mubr.bf16.gmra.mxu0 %v1791_v4  ;;  %v3514_v16 = vpop.f32.mrf.mxu0  ;;  %v4999_v23 = vadd.f32 %v4899_v15, %v1573_v7 }
 0x1e5   : > { %v3626_v17 = vpop.f32.mrf.mxu1 }
 0x1e6   : > { %v1576_v18 = vadd.f32 %v3625_v14, %v3513_v5  ;;  %v3515_v19 = vpop.f32.mrf.mxu0  ;;  %5583 = vst [vmem:[#allocation31_spill] sm:$0xff] %v4999_v23 }
 0x1e7   : > { %v3627_v22 = vpop.f32.mrf.mxu1  ;;  %v3516_v25 = vadd.f32 %v3515_v19, %v3514_v16 }
 0x1e8   : > { %v5002_v24 = vadd.f32 %v4899_v15, %v1576_v18  ;;  %v3628_v26 = vadd.f32 %v3627_v22, %v3626_v17  ;;  %v3517_v27 = vpop.f32.mrf.mxu0 }
 0x1e9   : > { %v3629_v28 = vpop.f32.mrf.mxu1 }
 0x1ea   : > { %5584 = vst [vmem:[#allocation32_spill] sm:$0xff] %v5002_v24  ;;  %v3518_v29 = vpop.f32.mrf.mxu0  ;;  %v1792_v32 = vpack.c.bf16 %v5002_v24, %v4999_v23  ;;  %v1581_v41 = vadd.f32 %v3628_v26, %v3516_v25 }
 0x1eb   : > { %v3519_v35 = vadd.f32 %v3518_v29, %v3517_v27  ;;  %v3630_v40 = vpop.f32.mrf.mxu1 }
 0x1ec   : > { %v3631_v42 = vadd.f32 %v3630_v40, %v3629_v28  ;;  %3780 = vmatprep.mubr.bf16.mxu0 %v1792_v32  ;;  %v3520_v43 = vpop.f32.mrf.mxu0  ;;  %v5007_v48 = vadd.f32 %v4899_v15, %v1581_v41 }
 0x1ed   : > { %v3632_v44 = vpop.f32.mrf.mxu1 }
 0x1ee   : > { %v1584_v45 = vadd.f32 %v3631_v42, %v3519_v35  ;;  %v3521_v46 = vpop.f32.mrf.mxu0 }
 0x1ef   : > { %v3633_v47 = vpop.f32.mrf.mxu1  ;;  %v3522_v50 = vadd.f32 %v3521_v46, %v3520_v43 }
 0x1f0   : > { %v5010_v49 = vadd.f32 %v4899_v15, %v1584_v45  ;;  %v3634_v56 = vadd.f32 %v3633_v47, %v3632_v44  ;;  %v3523_v59 = vpop.f32.mrf.mxu0  ;;  %v5031_v45 = vld [vmem:[%s5505_s5] ss:$0 sm:$0xff] }
 0x1f1   : > { %v3635_v60 = vpop.f32.mrf.mxu1 }
 0x1f2   : > { %5585 = vst [vmem:[#allocation33_spill] sm:$0xff] %v5010_v49  ;;  %v3524_v61 = vpop.f32.mrf.mxu0  ;;  %v1793_v55 = vpack.c.bf16 %v5010_v49, %v5007_v48  ;;  %v1589_v2 = vadd.f32 %v3634_v56, %v3522_v50 }
 0x1f3   : > { %v3525_v0 = vadd.f32 %v3524_v61, %v3523_v59  ;;  %v3636_v1 = vpop.f32.mrf.mxu1 }
 0x1f4   : > { %v3637_v3 = vadd.f32 %v3636_v1, %v3635_v60  ;;  %3781 = vmatmul.mubr.bf16.gmra.mxu0 %v1793_v55  ;;  %v3526_v4 = vpop.f32.mrf.mxu0  ;;  %v5015_v16 = vadd.f32 %v4899_v15, %v1589_v2 }
 0x1f5   : > { %v3638_v5 = vpop.f32.mrf.mxu1 }
 0x1f6   : > { %v1592_v6 = vadd.f32 %v3637_v3, %v3525_v0  ;;  %v3527_v7 = vpop.f32.mrf.mxu0  ;;  %5586 = vst [vmem:[#allocation34_spill] sm:$0xff] %v5015_v16 }
 0x1f7   : > { %v3639_v14 = vpop.f32.mrf.mxu1  ;;  %v3528_v18 = vadd.f32 %v3527_v7, %v3526_v4 }
 0x1f8   : > { %v5018_v17 = vadd.f32 %v4899_v15, %v1592_v6  ;;  %v3640_v19 = vadd.f32 %v3639_v14, %v3638_v5  ;;  %v3529_v22 = vpop.f32.mrf.mxu0 }
 0x1f9   : > { %v3641_v25 = vpop.f32.mrf.mxu1 }
 0x1fa   : > { %5587 = vst [vmem:[#allocation35_spill] sm:$0xff] %v5018_v17  ;;  %v3530_v26 = vpop.f32.mrf.mxu0  ;;  %v1794_v27 = vpack.c.bf16 %v5018_v17, %v5015_v16  ;;  %v1597_v32 = vadd.f32 %v3640_v19, %v3528_v18 }
 0x1fb   : > { %v3531_v28 = vadd.f32 %v3530_v26, %v3529_v22  ;;  %v3642_v29 = vpop.f32.mrf.mxu1 }
 0x1fc   : > { %v3643_v35 = vadd.f32 %v3642_v29, %v3641_v25  ;;  %3784 = vmatprep.mubr.bf16.mxu0 %v1794_v27  ;;  %v5023_v43 = vadd.f32 %v4899_v15, %v1597_v32 }
 0x1fd   : > { %v3806_v40 = vpop.f32.mrf.mxu1 }
 0x1fe   : > { %v1600_v41 = vadd.f32 %v3643_v35, %v3531_v28 }
 0x1ff   : > { %v2286_v42 = vpop.f32.mrf.mxu1 }
 0x200   : > { %v5026_v44 = vadd.f32 %v4899_v15, %v1600_v41  ;;  %v5036_v56 = vadd.f32 %v5031_v45, %v2286_v42  ;;  %v5042_v15 = vadd.f32 %v3806_v40, %v5031_v45 }
 0x201   : > { %v3807_v46 = vpop.f32.mrf.mxu1 }
 0x202   : > { %5588 = vst [vmem:[#allocation36_spill] sm:$0xff] %v5026_v44  ;;  %v1795_v47 = vpack.c.bf16 %v5026_v44, %v5023_v43  ;;  %v5045_v61 = vadd.f32 %v3807_v46, %v5031_v45 }
 0x203   : > { %v2289_v50 = vpop.f32.mrf.mxu1 }
 0x204   : > { %v5039_v59 = vadd.f32 %v5031_v45, %v2289_v50  ;;  %3785 = vmatmul.mubr.bf16.gmra.mxu0 %v1795_v47  ;;  %v2485_v2 = vpack.c.bf16 %v5045_v61, %v5042_v15  ;;  %v4224_v50 = vld [vmem:[#allocation13 + $0x38] sm:$0xff]  }
 0x205   : > { %v3810_v60 = vpop.f32.mrf.mxu1  ;;  %3884 = vmatprep.subr.bf16.mxu1 %v4224_v50 }
 0x206   : > { %v2484_v55 = vpack.c.bf16 %v5039_v59, %v5036_v56  ;;  %v5058_v7 = vadd.f32 %v3810_v60, %v5031_v45  ;;  %3885 = vmatpush3.bf16.msra.mxu1 %v4224_v50 }
 0x207   : > { %v2302_v0 = vpop.f32.mrf.mxu1 }
 0x208   : > { %3852 = vmatprep.mubr.bf16.mxu0 %v2484_v55  ;;  %v5052_v4 = vadd.f32 %v5031_v45, %v2302_v0 }
 0x209   : > { %v3811_v1 = vpop.f32.mrf.mxu1 }
 0x20a   : > { %v5061_v14 = vadd.f32 %v3811_v1, %v5031_v45  ;;  %v4225_v1 = vld [vmem:[#allocation13 + $0x30] sm:$0xff]  }
 0x20b   : > { %v2305_v3 = vpop.f32.mrf.mxu1  ;;  %3886 = vmatprep.subr.bf16.mxu1 %v4225_v1 }
 0x20c   : > { %v5055_v5 = vadd.f32 %v5031_v45, %v2305_v3  ;;  %3853 = vmatmul.mubr.bf16.vlgmr.msra.gmra.mxu0 %v2485_v2  ;;  %v2487_v25 = vpack.c.bf16 %v5061_v14, %v5058_v7  ;;  %3887 = vmatpush3.bf16.msra.mxu1 %v4225_v1 }
 0x20d   : > { %v3814_v6 = vpop.f32.mrf.mxu1 }
 0x20e   : > { %v2486_v18 = vpack.c.bf16 %v5055_v5, %v5052_v4  ;;  %v5074_v32 = vadd.f32 %v3814_v6, %v5031_v45 }
 0x20f   : > { %v2318_v19 = vpop.f32.mrf.mxu1 }
 0x210   : > { %3856 = vmatprep.mubr.bf16.mxu0 %v2486_v18  ;;  %v5068_v27 = vadd.f32 %v5031_v45, %v2318_v19 }
 0x211   : > { %v3815_v22 = vpop.f32.mrf.mxu1 }
 0x212   : > { %v5077_v35 = vadd.f32 %v3815_v22, %v5031_v45 }
 0x213   : > { %v2321_v26 = vpop.f32.mrf.mxu1 }
 0x214   : > { %v5071_v28 = vadd.f32 %v5031_v45, %v2321_v26  ;;  %3857 = vmatmul.mubr.bf16.gmra.mxu0 %v2487_v25  ;;  %v2489_v46 = vpack.c.bf16 %v5077_v35, %v5074_v32 }
 0x215   : > { %v3818_v29 = vpop.f32.mrf.mxu1 }
 0x216   : > { %v2488_v40 = vpack.c.bf16 %v5071_v28, %v5068_v27  ;;  %v5090_v2 = vadd.f32 %v3818_v29, %v5031_v45 }
 0x217   : > { %v2334_v41 = vpop.f32.mrf.mxu1 }
 0x218   : > { %3860 = vmatprep.mubr.bf16.mxu0 %v2488_v40  ;;  %v5084_v60 = vadd.f32 %v5031_v45, %v2334_v41 }
 0x219   : > { %v3819_v42 = vpop.f32.mrf.mxu1 }
 0x21a   : > { %v5093_v3 = vadd.f32 %v3819_v42, %v5031_v45 }
 0x21b   : > { %v2337_v47 = vpop.f32.mrf.mxu1 }
 0x21c   : > { %v5087_v55 = vadd.f32 %v5031_v45, %v2337_v47  ;;  %3861 = vmatmul.mubr.bf16.gmra.mxu0 %v2489_v46  ;;  %v2491_v22 = vpack.c.bf16 %v5093_v3, %v5090_v2 }
 0x21d   : > { %v3822_v0 = vpop.f32.mrf.mxu1 }
 0x21e   : > { %v2490_v6 = vpack.c.bf16 %v5087_v55, %v5084_v60  ;;  %v5106_v41 = vadd.f32 %v3822_v0, %v5031_v45 }
 0x21f   : > { %v2350_v18 = vpop.f32.mrf.mxu1 }
 0x220   : > { %3864 = vmatprep.mubr.bf16.mxu0 %v2490_v6  ;;  %v5100_v26 = vadd.f32 %v5031_v45, %v2350_v18  ;;  %5591 = vst [vmem:[#allocation39_spill] sm:$0xff] %v5106_v41  ;;  %v4226_v18 = vld [vmem:[#allocation13 + $0x28] sm:$0xff]  }
 0x221   : > { %v3823_v19 = vpop.f32.mrf.mxu1  ;;  %3888 = vmatprep.subr.bf16.mxu1 %v4226_v18 }
 0x222   : > { %5589 = vst [vmem:[#allocation37_spill] sm:$0xff] %v5100_v26  ;;  %v5109_v42 = vadd.f32 %v3823_v19, %v5031_v45  ;;  %3889 = vmatpush3.bf16.msra.mxu1 %v4226_v18 }
 0x223   : > { %v2353_v25 = vpop.f32.mrf.mxu1 }
 0x224   : > { %v5103_v29 = vadd.f32 %v5031_v45, %v2353_v25  ;;  %3865 = vmatmul.mubr.bf16.gmra.mxu0 %v2491_v22  ;;  %5592 = vst [vmem:[#allocation40_spill] sm:$0xff] %v5109_v42  ;;  %v2493_v1 = vpack.c.bf16 %v5109_v42, %v5106_v41  ;;  %v4227_v25 = vld [vmem:[#allocation13 + $0x20] sm:$0xff]  }
 0x225   : > { %v3826_v40 = vpop.f32.mrf.mxu1  ;;  %3890 = vmatprep.subr.bf16.mxu1 %v4227_v25 }
 0x226   : > { %5590 = vst [vmem:[#allocation38_spill] sm:$0xff] %v5103_v29  ;;  %v2492_v46 = vpack.c.bf16 %v5103_v29, %v5100_v26  ;;  %v5122_v17 = vadd.f32 %v3826_v40, %v5031_v45  ;;  %3891 = vmatpush3.bf16.msra.mxu1 %v4227_v25 }
 0x227   : > { %v2366_v47 = vpop.f32.mrf.mxu1 }
 0x228   : > { %3868 = vmatprep.mubr.bf16.mxu0 %v2492_v46  ;;  %v5116_v22 = vadd.f32 %v5031_v45, %v2366_v47  ;;  %5595 = vst [vmem:[#allocation43_spill] sm:$0xff] %v5122_v17 }
 0x229   : > { %v3827_v50 = vpop.f32.mrf.mxu1 }
 0x22a   : > { %5593 = vst [vmem:[#allocation41_spill] sm:$0xff] %v5116_v22  ;;  %v5125_v46 = vadd.f32 %v3827_v50, %v5031_v45 }
 0x22b   : > { %v2369_v6 = vpop.f32.mrf.mxu1 }
 0x22c   : > { %v5119_v0 = vadd.f32 %v5031_v45, %v2369_v6  ;;  %3869 = vmatmul.mubr.bf16.gmra.mxu0 %v2493_v1  ;;  %5596 = vst [vmem:[#allocation44_spill] sm:$0xff] %v5125_v46  ;;  %v2495_v1 = vpack.c.bf16 %v5125_v46, %v5122_v17 }
 0x22d   : > { %v3830_v19 = vpop.f32.mrf.mxu1 }
 0x22e   : > { %5594 = vst [vmem:[#allocation42_spill] sm:$0xff] %v5119_v0  ;;  %v2494_v44 = vpack.c.bf16 %v5119_v0, %v5116_v22  ;;  %v5138_v0 = vadd.f32 %v3830_v19, %v5031_v45 }
 0x22f   : > { %v2382_v16 = vpop.f32.mrf.mxu1 }
 0x230   : > { %3872 = vmatprep.mubr.bf16.mxu0 %v2494_v44  ;;  %v5132_v24 = vadd.f32 %v5031_v45, %v2382_v16  ;;  %5599 = vst [vmem:[#allocation47_spill] sm:$0xff] %v5138_v0 }
 0x231   : > { %v3831_v47 = vpop.f32.mrf.mxu1 }
 0x232   : > { %5597 = vst [vmem:[#allocation45_spill] sm:$0xff] %v5132_v24  ;;  %v5141_v18 = vadd.f32 %v3831_v47, %v5031_v45  ;;  %v4229_v47 = vld [vmem:[#allocation13 + $0x10] sm:$0xff]  }
 0x233   : > { %v2385_v6 = vpop.f32.mrf.mxu1 }
 0x234   : > { %v5135_v40 = vadd.f32 %v5031_v45, %v2385_v6  ;;  %3873 = vmatmul.mubr.bf16.gmra.mxu0 %v2495_v1  ;;  %5600 = vst [vmem:[#allocation48_spill] sm:$0xff] %v5141_v18  ;;  %v2497_v16 = vpack.c.bf16 %v5141_v18, %v5138_v0  ;;  %v4228_v6 = vld [vmem:[#allocation13 + $0x18] sm:$0xff]  }
 0x235   : > { %v3834_v50 = vpop.f32.mrf.mxu1  ;;  %3892 = vmatprep.subr.bf16.mxu1 %v4228_v6 }
 0x236   : > { %5598 = vst [vmem:[#allocation46_spill] sm:$0xff] %v5135_v40  ;;  %v2496_v44 = vpack.c.bf16 %v5135_v40, %v5132_v24  ;;  %v5154_v46 = vadd.f32 %v3834_v50, %v5031_v45  ;;  %3893 = vmatpush3.bf16.msra.mxu1 %v4228_v6  ;;  %v5166_v50 = vld [vmem:[%s5605_s24] ss:$0 sm:$0xff]  ;;  %s4422_s24 = sshll.u32 %s4531_s7, 4  ;;  %s4423_s24 = int_to_ptr.vmem [resolvable:$false] %s4422_s24 }
 0x237   : > { %v2398_v49 = vpop.f32.mrf.mxu1  ;;  %3894 = vmatprep.subr.bf16.mxu1 %v4229_v47  ;;  %v1758_v24 = vadd.f32 %v5166_v50, %v4943_v53  ;;  %s4424_s16 = scalar_lea.vmem %s4423_s24, 8192  ;;  %p4425_p2 = scmp.lt.s32.totalorder %s5449_s28, %s4423_s24 }
 0x238   : > { %3876 = vmatprep.mubr.bf16.mxu0 %v2496_v44  ;;  %v5148_v1 = vadd.f32 %v5031_v45, %v2398_v49  ;;  %5603 = vst [vmem:[#allocation51_spill] sm:$0xff] %v5154_v46  ;;  %p4426_p13 = scmp.lt.s32.totalorder %s4424_s16, %s4418_s23 }
 0x239   : > { %v3835_v25 = vpop.f32.mrf.mxu1 }
 0x23a   : > { %5601 = vst [vmem:[#allocation49_spill] sm:$0xff] %v5148_v1  ;;  %v5157_v44 = vadd.f32 %v3835_v25, %v5031_v45  ;;  %3895 = vmatpush3.bf16.msra.mxu1 %v4229_v47  ;;  %p4427_p6 = por %p4426_p13, %p4425_p2 }
 0x23b   : > { %v2401_v23 = vpop.f32.mrf.mxu1 }
 0x23c   : > { %v5151_v19 = vadd.f32 %v5031_v45, %v2401_v23  ;;  %3877 = vmatmul.mubr.bf16.gmra.mxu0 %v2497_v16  ;;  %5604 = vst [vmem:[#allocation52_spill] sm:$0xff] %v5157_v44  ;;  %v2499_v49 = vpack.c.bf16 %v5157_v44, %v5154_v46  ;;  %v4230_v23 = vld [vmem:[#allocation13 + $0x8] sm:$0xff]   ;;  %v1750_v45 = vadd.f32 %v5166_v50, %v4910_v37  ;;  %v4231_v16 = vld [vmem:[#allocation13] sm:$0xff]   ;;  %p4428_p3 = pnand %p4427_p6, %p4421_p5 }
 0x23d   : > { %3896 = vmatprep.subr.bf16.mxu1 %v4230_v23 }
 0x23e   : > { %5602 = vst [vmem:[#allocation50_spill] sm:$0xff] %v5151_v19  ;;  %v2498_v40 = vpack.c.bf16 %v5151_v19, %v5148_v1  ;;  %3897 = vmatpush3.bf16.msra.mxu1 %v4230_v23 }
 0x23f   : > { %3898 = vmatprep.subr.bf16.mxu1 %v4231_v16 }
 0x240   : > { %3880 = vmatprep.mubr.bf16.mxu0 %v2498_v40 }
 0x242   : > { %3899 = vmatpush3.bf16.msra.mxu1 %v4231_v16 }
 0x244   : > { %3881 = vmatmul.mubr.bf16.gmra.mxu0 %v2499_v49  ;;  %v1754_v49 = vadd.f32 %v5166_v50, %v4927_v11  ;;  %v1762_v11 = vadd.f32 %v5166_v50, %v4959_v30 }
 0x254   : > { %v3758_v25 = vpop.f32.mrf.mxu0 }
 0x255   : > { %v2023_v6 = vadd.f32 %v3758_v25, %v1750_v45 }
 0x256   : > { %v1894_v40 = vpop.f32.mrf.mxu0 }
 0x258   : > { %v3759_v19 = vpop.f32.mrf.mxu0 }
 0x25a   : > { %v1897_v47 = vpop.f32.mrf.mxu0 }
 0x264   : > { %v3762_v23 = vpop.f32.mrf.mxu0 }
 0x265   : > { %v2027_v44 = vadd.f32 %v3762_v23, %v1754_v49 }
 0x266   : > { %v1910_v1 = vpop.f32.mrf.mxu0 }
 0x268   : > { %v3763_v46 = vpop.f32.mrf.mxu0 }
 0x26a   : > { %v1913_v18 = vpop.f32.mrf.mxu0 }
 0x274   : > { %v3766_v37 = vpop.f32.mrf.mxu0 }
 0x275   : > { %v5174_v0 = vadd.f32 %v3766_v37, %v1758_v24  ;;  %v1766_v24 = vadd.f32 %v5166_v50, %v4975_v10 }
 0x276   : > { %v5176_v45 = vpop.f32.mrf.mxu0 }
 0x278   : > { %v5178_v25 = vpop.f32.mrf.mxu0 }
 0x27a   : > { %v5180_v16 = vpop.f32.mrf.mxu0 }
 0x284   : > { %v3770_v22 = vpop.f32.mrf.mxu0 }
 0x285   : > { %v5184_v49 = vadd.f32 %v3770_v22, %v1762_v11  ;;  %v1770_v22 = vadd.f32 %v5166_v50, %v4991_v62 }
 0x286   : > { %v5186_v23 = vpop.f32.mrf.mxu0 }
 0x288   : > { %v5188_v17 = vpop.f32.mrf.mxu0 }
 0x28a   : > { %v5190_v53 = vpop.f32.mrf.mxu0 }
 0x294   : > { %v3774_v37 = vpop.f32.mrf.mxu0 }
 0x295   : > { %v5194_v39 = vadd.f32 %v3774_v37, %v1766_v24  ;;  %v1774_v24 = vadd.f32 %v5166_v50, %v5007_v48 }
 0x296   : > { %v5196_v29 = vpop.f32.mrf.mxu0 }
 0x297   : > { %5606 = vst [vmem:[#allocation53_spill] sm:$0xff] %v5194_v39 }
 0x298   : > { %v5198_v63 = vpop.f32.mrf.mxu0 }
 0x29a   : > { %v5200_v30 = vpop.f32.mrf.mxu0 }
 0x29b   : > { %5607 = vst [vmem:[#allocation54_spill] sm:$0xff] %v5200_v30 }
 0x2a4   : > { %v3778_v11 = vpop.f32.mrf.mxu0 }
 0x2a5   : > { %v5204_v36 = vadd.f32 %v3778_v11, %v1770_v22  ;;  %v1778_v22 = vadd.f32 %v5166_v50, %v5023_v43  ;;  %v2415_v43 = vadd.f32 %v5042_v15, %v2023_v6  ;;  %v1755_v15 = vadd.f32 %v5166_v50, %v4930_v12 }
 0x2a6   : > { %v5206_v42 = vpop.f32.mrf.mxu0 }
 0x2a7   : > { %5608 = vst [vmem:[#allocation55_spill] sm:$0xff] %v5204_v36  ;;  %v1748_v36 = vadd.f32 %v5166_v50, %v4902_v20  ;;  %v5242_v20 = vld [vmem:[%s5615_s20] ss:$0 sm:$0xff] }
 0x2a8   : > { %v5208_v26 = vpop.f32.mrf.mxu0  ;;  %v2454_v6 = vadd.f32 %v5242_v20, %v2415_v43 }
 0x2a9   : > { %5609 = vst [vmem:[#allocation56_spill] sm:$0xff] %v5208_v26 }
 0x2aa   : > { %v5210_v10 = vpop.f32.mrf.mxu0 }
 0x2ab   : > { %5610 = vst [vmem:[#allocation57_spill] sm:$0xff] %v5210_v10  ;;  %v1751_v10 = vadd.f32 %v5166_v50, %v4913_v38 }
 0x2b4   : > { %v3782_v37 = vpop.f32.mrf.mxu0 }
 0x2b5   : > { %v5214_v41 = vadd.f32 %v3782_v37, %v1774_v24  ;;  %v2021_v37 = vadd.f32 %v1894_v40, %v1748_v36 }
 0x2b6   : > { %v5216_v39 = vpop.f32.mrf.mxu0 }
 0x2b7   : > { %5611 = vst [vmem:[#allocation58_spill] sm:$0xff] %v5214_v41  ;;  %5612 = vst [vmem:[#allocation59_spill] sm:$0xff] %v5216_v39  ;;  %v2024_v41 = vadd.f32 %v3759_v19, %v1751_v10  ;;  %v2413_v38 = vadd.f32 %v5036_v56, %v2021_v37  ;;  %v1752_v19 = vadd.f32 %v5166_v50, %v4919_v57 }
 0x2b8   : > { %v5218_v30 = vpop.f32.mrf.mxu0  ;;  %v2419_v57 = vadd.f32 %v5058_v7, %v2027_v44  ;;  %v1759_v7 = vadd.f32 %v5166_v50, %v4946_v54 }
 0x2b9   : > { %5613 = vst [vmem:[#allocation60_spill] sm:$0xff] %v5218_v30  ;;  %v1749_v30 = vadd.f32 %v5166_v50, %v4905_v21  ;;  %v2416_v36 = vadd.f32 %v5045_v61, %v2024_v41  ;;  %v2452_v61 = vadd.f32 %v5242_v20, %v2413_v38  ;;  %v1756_v38 = vadd.f32 %v5166_v50, %v4935_v33 }
 0x2ba   : > { %v5220_v62 = vpop.f32.mrf.mxu0  ;;  %v2032_v33 = vadd.f32 %v5178_v25, %v1759_v7 }
 0x2bb   : > { %5614 = vst [vmem:[#allocation61_spill] sm:$0xff] %v5220_v62  ;;  %v2022_v39 = vadd.f32 %v1897_v47, %v1749_v30  ;;  %v2025_v47 = vadd.f32 %v1910_v1, %v1752_v19  ;;  %v1753_v30 = vadd.f32 %v5166_v50, %v4922_v58  ;;  %v2455_v41 = vadd.f32 %v5242_v20, %v2416_v36 }
 0x2bc   : > { %v2424_v25 = vadd.f32 %v5077_v35, %v2032_v33  ;;  %v1761_v35 = vadd.f32 %v5166_v50, %v4954_v9 }
 0x2bd   : > { %v2414_v40 = vadd.f32 %v5039_v59, %v2022_v39  ;;  %v2026_v39 = vadd.f32 %v1913_v18, %v1753_v30  ;;  %v2417_v1 = vadd.f32 %v5052_v4, %v2025_v47  ;;  %v2458_v18 = vadd.f32 %v5242_v20, %v2419_v57 }
 0x2be   : > { %v2463_v7 = vadd.f32 %v5242_v20, %v2424_v25 }
 0x2bf   : > { %v2453_v12 = vadd.f32 %v5242_v20, %v2414_v40  ;;  %v2418_v36 = vadd.f32 %v5055_v5, %v2026_v39  ;;  %v2456_v47 = vadd.f32 %v5242_v20, %v2417_v1  ;;  %v2423_v5 = vadd.f32 %v5074_v32, %v5174_v0 }
 0x2c0   : > { %v1760_v32 = vadd.f32 %v5166_v50, %v4951_v8  ;;  %v1763_v0 = vadd.f32 %v5166_v50, %v4962_v31 }
 0x2c2   : > { %v2036_v8 = vadd.f32 %v5188_v17, %v1763_v0 }
 0x2c4   : > { %v3786_v11 = vpop.f32.mrf.mxu0  ;;  %v2428_v17 = vadd.f32 %v5093_v3, %v2036_v8  ;;  %v1765_v3 = vadd.f32 %v5166_v50, %v4970_v52 }
 0x2c5   : > { %v5228_v48 = vadd.f32 %v3786_v11, %v1778_v22  ;;  %v2028_v22 = vadd.f32 %v3763_v46, %v1755_v15 }
 0x2c6   : > { %v5230_v24 = vpop.f32.mrf.mxu0 }
 0x2c7   : > { %v2420_v58 = vadd.f32 %v5061_v14, %v2028_v22  ;;  %v1757_v14 = vadd.f32 %v5166_v50, %v4938_v34  ;;  %v2457_v34 = vadd.f32 %v5242_v20, %v2418_v36 }
 0x2c8   : > { %v5234_v62 = vpop.f32.mrf.mxu0 }
 0x2c9   : > { %v2459_v22 = vadd.f32 %v5242_v20, %v2420_v58 }
 0x2ca   : > { %v5237_v26 = vpop.f32.mrf.mxu0 }
 0x2cc   : > { %v3854_v21 = vpop.f32.mrf.mxu0 }
 0x2cd   : > { %v2727_v56 = vadd.f32 %v3854_v21, %v2454_v6  ;;  %v2029_v6 = vadd.f32 %v5176_v45, %v1756_v38 }
 0x2ce   : > { %v2598_v10 = vpop.f32.mrf.mxu0 }
 0x2cf   : > { %v2725_v59 = vadd.f32 %v2598_v10, %v2452_v61  ;;  %v2759_v19 = vmax.f32 %v2727_v56, 0.0  ;;  %v2030_v61 = vadd.f32 %v5180_v16, %v1757_v14  ;;  %v2421_v57 = vadd.f32 %v5068_v27, %v2029_v6 }
 0x2d0   : > { %v3855_v11 = vpop.f32.mrf.mxu0  ;;  %v2462_v16 = vadd.f32 %v5242_v20, %v2423_v5 }
 0x2d1   : > { %v2728_v37 = vadd.f32 %v3855_v11, %v2455_v41  ;;  %v2757_v40 = vmax.f32 %v2725_v59, 0.0  ;;  %v2422_v1 = vadd.f32 %v5071_v28, %v2030_v61  ;;  %v2427_v28 = vadd.f32 %v5090_v2, %v5184_v49 }
 0x2d2   : > { %v2601_v43 = vpop.f32.mrf.mxu0  ;;  %v1764_v2 = vadd.f32 %v5166_v50, %v4967_v51  ;;  %v1767_v49 = vadd.f32 %v5166_v50, %v4978_v13  ;;  %v2467_v61 = vadd.f32 %v5242_v20, %v2428_v17 }
 0x2d3   : > { %v2760_v46 = vmax.f32 %v2728_v37, 0.0  ;;  %v2726_v21 = vadd.f32 %v2601_v43, %v2453_v12  ;;  %v2461_v9 = vadd.f32 %v5242_v20, %v2422_v1  ;;  %v5621_v1 = vld [vmem:[#allocation28_spill] sm:$0xff] }
 0x2d4   : > { %v3858_v44 = vpop.f32.mrf.mxu0  ;;  %v2040_v51 = vadd.f32 %v5198_v63, %v1767_v49  ;;  %v5620_v63 = vld [vmem:[#allocation40_spill] sm:$0xff]  ;;  %v5628_v49 = vld [vmem:[#allocation57_spill] sm:$0xff] }
 0x2d5   : > { %v2790_v15 = vpack.c.bf16 %v2760_v46, %v2759_v19  ;;  %v2758_v4 = vmax.f32 %v2726_v21, 0.0  ;;  %v2731_v54 = vadd.f32 %v3858_v44, %v2458_v18  ;;  %v2033_v19 = vadd.f32 %v5186_v23, %v1760_v32 }
 0x2d6   : > { %v2614_v30 = vpop.f32.mrf.mxu0  ;;  %v2460_v46 = vadd.f32 %v5242_v20, %v2421_v57  ;;  %v2034_v44 = vadd.f32 %v5190_v53, %v1761_v35  ;;  %v2466_v53 = vadd.f32 %v5242_v20, %v2427_v28  ;;  %v5618_v57 = vld [vmem:[#allocation54_spill] sm:$0xff]  ;;  %v2432_v32 = vadd.f32 %v5620_v63, %v2040_v51  ;;  %v5624_v28 = vld [vmem:[#allocation29_spill] sm:$0xff] }
 0x2d7   : > { %v2789_v10 = vpack.c.bf16 %v2758_v4, %v2757_v40  ;;  %v2729_v41 = vadd.f32 %v2614_v30, %v2456_v47  ;;  %v2763_v39 = vmax.f32 %v2731_v54, 0.0  ;;  %v2425_v40 = vadd.f32 %v5084_v60, %v2033_v19 }
 0x2d8   : > { %v3859_v56 = vpop.f32.mrf.mxu0  ;;  %v2426_v30 = vadd.f32 %v5087_v55, %v2034_v44  ;;  %v2037_v54 = vadd.f32 %v5196_v29, %v1764_v2  ;;  %v2471_v17 = vadd.f32 %v5242_v20, %v2432_v32 }
 0x2d9   : > { %v2732_v45 = vadd.f32 %v3859_v56, %v2459_v22  ;;  %3900 = vmatprep.mubr.bf16.mxu1 %v2789_v10  ;;  %v2761_v43 = vmax.f32 %v2729_v41, 0.0  ;;  %v2464_v22 = vadd.f32 %v5242_v20, %v2425_v40  ;;  %v5616_v41 = vld [vmem:[#allocation53_spill] sm:$0xff] }
 0x2da   : > { %v2617_v11 = vpop.f32.mrf.mxu0  ;;  %3901 = vmatmul.mubr.bf16.vlgmr.msra.gmra.mxu1 %v2790_v15  ;;  %v2465_v52 = vadd.f32 %v5242_v20, %v2426_v30 }
 0x2db   : > { %v2764_v59 = vmax.f32 %v2732_v45, 0.0  ;;  %v2730_v37 = vadd.f32 %v2617_v11, %v2457_v34  ;;  %v5617_v45 = vld [vmem:[#allocation39_spill] sm:$0xff]  ;;  %v2038_v11 = vadd.f32 %v5618_v57, %v1765_v3 }
 0x2dc   : > { %v3862_v12 = vpop.f32.mrf.mxu0  ;;  %v2431_v55 = vadd.f32 %v5617_v45, %v5616_v41 }
 0x2dd   : > { %v2792_v27 = vpack.c.bf16 %v2764_v59, %v2763_v39  ;;  %v2762_v58 = vmax.f32 %v2730_v37, 0.0  ;;  %v2735_v31 = vadd.f32 %v3862_v12, %v2462_v16  ;;  %v5619_v39 = vld [vmem:[#allocation37_spill] sm:$0xff] }
 0x2de   : > { %v2630_v21 = vpop.f32.mrf.mxu0  ;;  %v2429_v59 = vadd.f32 %v5619_v39, %v2037_v54  ;;  %v2470_v19 = vadd.f32 %v5242_v20, %v2431_v55  ;;  %v5630_v54 = vld [vmem:[#allocation44_spill] sm:$0xff] }
 0x2df   : > { %v2791_v38 = vpack.c.bf16 %v2762_v58, %v2761_v43  ;;  %v2733_v36 = vadd.f32 %v2630_v21, %v2460_v46  ;;  %v2767_v4 = vmax.f32 %v2735_v31, 0.0  ;;  %v1768_v43 = vadd.f32 %v5166_v50, %v5621_v1  ;;  %v5623_v46 = vld [vmem:[#allocation38_spill] sm:$0xff] }
 0x2e0   : > { %v3863_v18 = vpop.f32.mrf.mxu0  ;;  %v2430_v21 = vadd.f32 %v5623_v46, %v2038_v11  ;;  %v2468_v44 = vadd.f32 %v5242_v20, %v2429_v59  ;;  %v5635_v59 = vld [vmem:[#allocation32_spill] sm:$0xff]  ;;  %v5639_v46 = vld [vmem:[#allocation61_spill] sm:$0xff] }
 0x2e1   : > { %v2736_v23 = vadd.f32 %v3863_v18, %v2463_v7  ;;  %3904 = vmatprep.mubr.bf16.mxu1 %v2791_v38  ;;  %v2765_v33 = vmax.f32 %v2733_v36, 0.0  ;;  %v2041_v7 = vadd.f32 %v5206_v42, %v1768_v43  ;;  %v1769_v18 = vadd.f32 %v5166_v50, %v5624_v28 }
 0x2e2   : > { %v2633_v15 = vpop.f32.mrf.mxu0  ;;  %3905 = vmatmul.mubr.bf16.gmra.mxu1 %v2792_v27  ;;  %v5622_v27 = vld [vmem:[#allocation30_spill] sm:$0xff]  ;;  %v2469_v30 = vadd.f32 %v5242_v20, %v2430_v21 }
 0x2e3   : > { %v2768_v6 = vmax.f32 %v2736_v23, 0.0  ;;  %v2734_v14 = vadd.f32 %v2633_v15, %v2461_v9  ;;  %v1771_v58 = vadd.f32 %v5166_v50, %v5622_v27  ;;  %v5625_v23 = vld [vmem:[#allocation56_spill] sm:$0xff]  ;;  %v5637_v27 = vld [vmem:[#allocation58_spill] sm:$0xff] }
 0x2e4   : > { %v3866_v47 = vpop.f32.mrf.mxu0 }
 0x2e5   : > { %v2794_v60 = vpack.c.bf16 %v2768_v6, %v2767_v4  ;;  %v2766_v10 = vmax.f32 %v2734_v14, 0.0  ;;  %v2739_v13 = vadd.f32 %v3866_v47, %v2466_v53  ;;  %v2044_v9 = vadd.f32 %v5625_v23, %v1771_v58  ;;  %v5626_v4 = vld [vmem:[#allocation55_spill] sm:$0xff] }
 0x2e6   : > { %v2646_v5 = vpop.f32.mrf.mxu0  ;;  %v5627_v6 = vld [vmem:[#allocation43_spill] sm:$0xff]  ;;  %v2042_v53 = vadd.f32 %v5628_v49, %v1769_v18  ;;  %v5644_v49 = vld [vmem:[#allocation46_spill] sm:$0xff] }
 0x2e7   : > { %v2793_v56 = vpack.c.bf16 %v2766_v10, %v2765_v33  ;;  %v2737_v25 = vadd.f32 %v2646_v5, %v2464_v22  ;;  %v2771_v0 = vmax.f32 %v2739_v13, 0.0  ;;  %v2435_v14 = vadd.f32 %v5627_v6, %v5626_v4  ;;  %v5629_v33 = vld [vmem:[#allocation41_spill] sm:$0xff]  ;;  %v5638_v58 = vld [vmem:[#allocation47_spill] sm:$0xff]  ;;  %v5643_v4 = vld [vmem:[#allocation36_spill] sm:$0xff] }
 0x2e8   : > { %v3867_v34 = vpop.f32.mrf.mxu0  ;;  %v2436_v3 = vadd.f32 %v5630_v54, %v2044_v9  ;;  %v1779_v6 = vadd.f32 %v5166_v50, %v5643_v4 }
 0x2e9   : > { %v2740_v29 = vadd.f32 %v3867_v34, %v2467_v61  ;;  %3908 = vmatprep.mubr.bf16.mxu1 %v2793_v56  ;;  %v2769_v8 = vmax.f32 %v2737_v25, 0.0  ;;  %v5631_v56 = vld [vmem:[#allocation31_spill] sm:$0xff]  ;;  %v5632_v61 = vld [vmem:[#allocation33_spill] sm:$0xff]  ;;  %v2474_v45 = vadd.f32 %v5242_v20, %v2435_v14  ;;  %v5633_v34 = vld [vmem:[#allocation42_spill] sm:$0xff] }
 0x2ea   : > { %v2649_v37 = vpop.f32.mrf.mxu0  ;;  %3909 = vmatmul.mubr.bf16.gmra.mxu1 %v2794_v60  ;;  %v2433_v60 = vadd.f32 %v5629_v33, %v2041_v7  ;;  %v1772_v13 = vadd.f32 %v5166_v50, %v5631_v56  ;;  %v1775_v41 = vadd.f32 %v5166_v50, %v5632_v61  ;;  %v2434_v57 = vadd.f32 %v5633_v34, %v2042_v53  ;;  %v5640_v7 = vld [vmem:[#allocation45_spill] sm:$0xff] }
 0x2eb   : > { %v2772_v16 = vmax.f32 %v2740_v29, 0.0  ;;  %v2738_v12 = vadd.f32 %v2649_v37, %v2465_v52  ;;  %v5634_v52 = vld [vmem:[#allocation59_spill] sm:$0xff]  ;;  %v1773_v37 = vadd.f32 %v5166_v50, %v5635_v59  ;;  %v2475_v43 = vadd.f32 %v5242_v20, %v2436_v3  ;;  %v5647_v34 = vld [vmem:[#allocation49_spill] sm:$0xff] }
 0x2ec   : > { %v3870_v35 = vpop.f32.mrf.mxu0  ;;  %v2045_v39 = vadd.f32 %v5634_v52, %v1772_v13  ;;  %v2472_v63 = vadd.f32 %v5242_v20, %v2433_v60  ;;  %v5645_v60 = vld [vmem:[#allocation35_spill] sm:$0xff] }
 0x2ed   : > { %v2796_v38 = vpack.c.bf16 %v2772_v16, %v2771_v0  ;;  %v2770_v31 = vmax.f32 %v2738_v12, 0.0  ;;  %v2743_v15 = vadd.f32 %v3870_v35, %v2470_v19  ;;  %v5636_v0 = vld [vmem:[#allocation60_spill] sm:$0xff]  ;;  %v2439_v19 = vadd.f32 %v5638_v58, %v5637_v27  ;;  %v5646_v13 = vld [vmem:[#allocation51_spill] sm:$0xff] }
 0x2ee   : > { %v2662_v36 = vpop.f32.mrf.mxu0  ;;  %v2048_v16 = vadd.f32 %v5636_v0, %v1775_v41  ;;  %v2046_v21 = vadd.f32 %v5639_v46, %v1773_v37  ;;  %v2437_v28 = vadd.f32 %v5640_v7, %v2045_v39  ;;  %v2443_v61 = vadd.f32 %v5646_v13, %v5228_v48  ;;  %v5649_v37 = vld [vmem:[#allocation50_spill] sm:$0xff] }
 0x2ef   : > { %v2795_v40 = vpack.c.bf16 %v2770_v31, %v2769_v8  ;;  %v2741_v47 = vadd.f32 %v2662_v36, %v2468_v44  ;;  %v2775_v22 = vmax.f32 %v2743_v15, 0.0  ;;  %v2473_v31 = vadd.f32 %v5242_v20, %v2434_v57  ;;  %v5641_v44 = vld [vmem:[#allocation48_spill] sm:$0xff]  ;;  %v5642_v15 = vld [vmem:[#allocation34_spill] sm:$0xff] }
 0x2f0   : > { %v3871_v2 = vpop.f32.mrf.mxu0  ;;  %v2440_v36 = vadd.f32 %v5641_v44, %v2048_v16  ;;  %v2478_v14 = vadd.f32 %v5242_v20, %v2439_v19  ;;  %v2438_v53 = vadd.f32 %v5644_v49, %v2046_v21  ;;  %v2476_v54 = vadd.f32 %v5242_v20, %v2437_v28 }
 0x2f1   : > { %v2744_v42 = vadd.f32 %v3871_v2, %v2471_v17  ;;  %3912 = vmatprep.mubr.bf16.mxu1 %v2795_v40  ;;  %v2773_v11 = vmax.f32 %v2741_v47, 0.0  ;;  %v1776_v17 = vadd.f32 %v5166_v50, %v5642_v15  ;;  %v2482_v59 = vadd.f32 %v5242_v20, %v2443_v61 }
 0x2f2   : > { %v2665_v10 = vpop.f32.mrf.mxu0  ;;  %3913 = vmatmul.mubr.bf16.gmra.mxu1 %v2796_v38  ;;  %v2479_v56 = vadd.f32 %v5242_v20, %v2440_v36  ;;  %v5377_v36 = vld [vmem:[%s5650_s1] ss:$0 sm:$0xff] }
 0x2f3   : > { %v2776_v5 = vmax.f32 %v2744_v42, 0.0  ;;  %v2742_v51 = vadd.f32 %v2665_v10, %v2469_v30  ;;  %v2049_v33 = vadd.f32 %v5230_v24, %v1776_v17  ;;  %v1777_v10 = vadd.f32 %v5166_v50, %v5645_v60 }
 0x2f4   : > { %v3874_v55 = vpop.f32.mrf.mxu0  ;;  %v2477_v50 = vadd.f32 %v5242_v20, %v2438_v53 }
 0x2f5   : > { %v2798_v25 = vpack.c.bf16 %v2776_v5, %v2775_v22  ;;  %v2774_v29 = vmax.f32 %v2742_v51, 0.0  ;;  %v2747_v1 = vadd.f32 %v3874_v55, %v2474_v45  ;;  %v2052_v22 = vadd.f32 %v5234_v62, %v1779_v6  ;;  %v5648_v62 = vld [vmem:[#allocation52_spill] sm:$0xff] }
 0x2f6   : > { %v2678_v32 = vpop.f32.mrf.mxu0  ;;  %v2050_v45 = vadd.f32 %v5237_v26, %v1777_v10  ;;  %v2441_v57 = vadd.f32 %v5647_v34, %v2049_v33 }
 0x2f7   : > { %v2797_v12 = vpack.c.bf16 %v2774_v29, %v2773_v11  ;;  %v2745_v8 = vadd.f32 %v2678_v32, %v2472_v63  ;;  %v2779_v23 = vmax.f32 %v2747_v1, 0.0 }
 0x2f8   : > { %v3875_v35 = vpop.f32.mrf.mxu0  ;;  %v2442_v63 = vadd.f32 %v5649_v37, %v2050_v45 }
 0x2f9   : > { %v2748_v38 = vadd.f32 %v3875_v35, %v2475_v43  ;;  %3916 = vmatprep.mubr.bf16.mxu1 %v2797_v12  ;;  %v2777_v47 = vmax.f32 %v2745_v8, 0.0  ;;  %v2480_v43 = vadd.f32 %v5242_v20, %v2441_v57 }
 0x2fa   : > { %v2681_v18 = vpop.f32.mrf.mxu0  ;;  %3917 = vmatmul.mubr.bf16.gmra.mxu1 %v2798_v25  ;;  %v2444_v25 = vadd.f32 %v5648_v62, %v2052_v22  ;;  %v2481_v46 = vadd.f32 %v5242_v20, %v2442_v63 }
 0x2fb   : > { %v2780_v9 = vmax.f32 %v2748_v38, 0.0  ;;  %v2746_v40 = vadd.f32 %v2681_v18, %v2473_v31 }
 0x2fc   : > { %v3878_v2 = vpop.f32.mrf.mxu0  ;;  %v2483_v27 = vadd.f32 %v5242_v20, %v2444_v25 }
 0x2fd   : > { %v2800_v42 = vpack.c.bf16 %v2780_v9, %v2779_v23  ;;  %v2778_v30 = vmax.f32 %v2746_v40, 0.0  ;;  %v2751_v51 = vadd.f32 %v3878_v2, %v2478_v14 }
 0x2fe   : > { %v2694_v3 = vpop.f32.mrf.mxu0 }
 0x2ff   : > { %v2799_v5 = vpack.c.bf16 %v2778_v30, %v2777_v47  ;;  %v2749_v55 = vadd.f32 %v2694_v3, %v2476_v54  ;;  %v2783_v29 = vmax.f32 %v2751_v51, 0.0 }
 0x300   : > { %v3879_v41 = vpop.f32.mrf.mxu0 }
 0x301   : > { %v2752_v24 = vadd.f32 %v3879_v41, %v2479_v56  ;;  %3920 = vmatprep.mubr.bf16.mxu1 %v2799_v5  ;;  %v2781_v26 = vmax.f32 %v2749_v55, 0.0 }
 0x302   : > { %v2697_v11 = vpop.f32.mrf.mxu0  ;;  %3921 = vmatmul.mubr.bf16.gmra.mxu1 %v2800_v42 }
 0x303   : > { %v2784_v52 = vmax.f32 %v2752_v24, 0.0  ;;  %v2750_v39 = vadd.f32 %v2697_v11, %v2477_v50 }
 0x304   : > { %v3882_v48 = vpop.f32.mrf.mxu0 }
 0x305   : > { %v2802_v32 = vpack.c.bf16 %v2784_v52, %v2783_v29  ;;  %v2782_v0 = vmax.f32 %v2750_v39, 0.0  ;;  %v2755_v1 = vadd.f32 %v3882_v48, %v2482_v59 }
 0x306   : > { %v2710_v16 = vpop.f32.mrf.mxu0 }
 0x307   : > { %v2801_v12 = vpack.c.bf16 %v2782_v0, %v2781_v26  ;;  %v2753_v19 = vadd.f32 %v2710_v16, %v2480_v43  ;;  %v2787_v8 = vmax.f32 %v2755_v1, 0.0 }
 0x308   : > { %v3883_v58 = vpop.f32.mrf.mxu0 }
 0x309   : > { %v2756_v35 = vadd.f32 %v3883_v58, %v2483_v27  ;;  %3924 = vmatprep.mubr.bf16.mxu1 %v2801_v12  ;;  %v2785_v7 = vmax.f32 %v2753_v19, 0.0 }
 0x30a   : > { %v2713_v21 = vpop.f32.mrf.mxu0  ;;  %3925 = vmatmul.mubr.bf16.gmra.mxu1 %v2802_v32 }
 0x30b   : > { %v2788_v38 = vmax.f32 %v2756_v35, 0.0  ;;  %v2754_v31 = vadd.f32 %v2713_v21, %v2481_v46 }
 0x30d   : > { %v2804_v28 = vpack.c.bf16 %v2788_v38, %v2787_v8  ;;  %v2786_v18 = vmax.f32 %v2754_v31, 0.0 }
 0x30f   : > { %v2803_v44 = vpack.c.bf16 %v2786_v18, %v2785_v7 }
 0x311   : > { %3928 = vmatprep.mubr.bf16.mxu1 %v2803_v44 }
 0x312   : > { %3929 = vmatmul.mubr.bf16.gmra.mxu1 %v2804_v28 }
 0x39a   : > { %v3902_v23 = vpop.f32.mrf.mxu1 }
 0x39b   : > { %v2919_v20 = vadd.f32 %v3902_v23, %v5377_v36 }
 0x39c   : > { %v2910_v9 = vpop.f32.mrf.mxu1 }
 0x39d   : > { %3039 = vst [vmem:[%s5380_s11 + $0x10] sm:$0xff] %v2919_v20  ;;  %v2911_v40 = vadd.f32 %v5377_v36, %v2910_v9 }
 0x39e   : > { %v3903_v15 = vpop.f32.mrf.mxu1 }
 0x39f   : > { %3037 = vst [vmem:[%s5380_s11] sm:$0xff] %v2911_v40  ;;  %v2922_v17 = vadd.f32 %v3903_v15, %v5377_v36 }
 0x3a0   : > { %v2913_v4 = vpop.f32.mrf.mxu1 }
 0x3a1   : > { %3040 = vst [vmem:[%s5380_s11 + $0x18] sm:$0xff] %v2922_v17  ;;  %v2914_v6 = vadd.f32 %v5377_v36, %v2913_v4 }
 0x3a2   : > { %v3906_v14 = vpop.f32.mrf.mxu1 }
 0x3a3   : > { %3038 = vst [vmem:[%s5380_s11 + $0x8] sm:$0xff] %v2914_v6  ;;  %v2935_v2 = vadd.f32 %v3906_v14, %v5377_v36 }
 0x3a4   : > { %v2926_v49 = vpop.f32.mrf.mxu1 }
 0x3a5   : > { %3043 = vst [vmem:[%s5380_s11 + $0x30] sm:$0xff] %v2935_v2  ;;  %v2927_v53 = vadd.f32 %v5377_v36, %v2926_v49 }
 0x3a6   : > { %v3907_v47 = vpop.f32.mrf.mxu1 }
 0x3a7   : > { %3041 = vst [vmem:[%s5380_s11 + $0x20] sm:$0xff] %v2927_v53  ;;  %v2938_v42 = vadd.f32 %v3907_v47, %v5377_v36 }
 0x3a8   : > { %v2929_v30 = vpop.f32.mrf.mxu1 }
 0x3a9   : > { %3044 = vst [vmem:[%s5380_s11 + $0x38] sm:$0xff] %v2938_v42  ;;  %v2930_v33 = vadd.f32 %v5377_v36, %v2929_v30 }
 0x3aa   : > { %v3910_v60 = vpop.f32.mrf.mxu1 }
 0x3ab   : > { %3042 = vst [vmem:[%s5380_s11 + $0x28] sm:$0xff] %v2930_v33  ;;  %v2951_v10 = vadd.f32 %v3910_v60, %v5377_v36 }
 0x3ac   : > { %v2942_v54 = vpop.f32.mrf.mxu1 }
 0x3ad   : > { %3047 = vst [vmem:[%s5380_s11 + $0x50] sm:$0xff] %v2951_v10  ;;  %v2943_v3 = vadd.f32 %v5377_v36, %v2942_v54 }
 0x3ae   : > { %v3911_v22 = vpop.f32.mrf.mxu1 }
 0x3af   : > { %3045 = vst [vmem:[%s5380_s11 + $0x40] sm:$0xff] %v2943_v3  ;;  %v2954_v5 = vadd.f32 %v3911_v22, %v5377_v36 }
 0x3b0   : > { %v2945_v51 = vpop.f32.mrf.mxu1 }
 0x3b1   : > { %3048 = vst [vmem:[%s5380_s11 + $0x58] sm:$0xff] %v2954_v5  ;;  %v2946_v56 = vadd.f32 %v5377_v36, %v2945_v51 }
 0x3b2   : > { %v3914_v13 = vpop.f32.mrf.mxu1 }
 0x3b3   : > { %3046 = vst [vmem:[%s5380_s11 + $0x48] sm:$0xff] %v2946_v56  ;;  %v2967_v61 = vadd.f32 %v3914_v13, %v5377_v36 }
 0x3b4   : > { %v2958_v41 = vpop.f32.mrf.mxu1 }
 0x3b5   : > { %3051 = vst [vmem:[%s5380_s11 + $0x70] sm:$0xff] %v2967_v61  ;;  %v2959_v45 = vadd.f32 %v5377_v36, %v2958_v41 }
 0x3b6   : > { %v3915_v55 = vpop.f32.mrf.mxu1 }
 0x3b7   : > { %3049 = vst [vmem:[%s5380_s11 + $0x60] sm:$0xff] %v2959_v45  ;;  %v2970_v24 = vadd.f32 %v3915_v55, %v5377_v36 }
 0x3b8   : > { %v2961_v50 = vpop.f32.mrf.mxu1 }
 0x3b9   : > { %3052 = vst [vmem:[%s5380_s11 + $0x78] sm:$0xff] %v2970_v24  ;;  %v2962_v34 = vadd.f32 %v5377_v36, %v2961_v50 }
 0x3ba   : > { %v3918_v57 = vpop.f32.mrf.mxu1 }
 0x3bb   : > { %3050 = vst [vmem:[%s5380_s11 + $0x68] sm:$0xff] %v2962_v34  ;;  %v2983_v11 = vadd.f32 %v3918_v57, %v5377_v36 }
 0x3bc   : > { %v2974_v62 = vpop.f32.mrf.mxu1 }
 0x3bd   : > { %3055 = vst [vmem:[%s5380_s11 + $0x90] sm:$0xff] %v2983_v11  ;;  %v2975_v25 = vadd.f32 %v5377_v36, %v2974_v62 }
 0x3be   : > { %v3919_v29 = vpop.f32.mrf.mxu1 }
 0x3bf   : > { %3053 = vst [vmem:[%s5380_s11 + $0x80] sm:$0xff] %v2975_v25  ;;  %v2986_v52 = vadd.f32 %v3919_v29, %v5377_v36 }
 0x3c0   : > { %v2977_v39 = vpop.f32.mrf.mxu1 }
 0x3c1   : > { %3056 = vst [vmem:[%s5380_s11 + $0x98] sm:$0xff] %v2986_v52  ;;  %v2978_v59 = vadd.f32 %v5377_v36, %v2977_v39 }
 0x3c2   : > { %v3922_v48 = vpop.f32.mrf.mxu1 }
 0x3c3   : > { %3054 = vst [vmem:[%s5380_s11 + $0x88] sm:$0xff] %v2978_v59  ;;  %v2999_v37 = vadd.f32 %v3922_v48, %v5377_v36 }
 0x3c4   : > { %v2990_v63 = vpop.f32.mrf.mxu1 }
 0x3c5   : > { %3059 = vst [vmem:[%s5380_s11 + $0xb0] sm:$0xff] %v2999_v37  ;;  %v2991_v26 = vadd.f32 %v5377_v36, %v2990_v63 }
 0x3c6   : > { %v3923_v32 = vpop.f32.mrf.mxu1 }
 0x3c7   : > { %3057 = vst [vmem:[%s5380_s11 + $0xa0] sm:$0xff] %v2991_v26  ;;  %v3002_v0 = vadd.f32 %v3923_v32, %v5377_v36 }
 0x3c8   : > { %v2993_v16 = vpop.f32.mrf.mxu1 }
 0x3c9   : > { %3060 = vst [vmem:[%s5380_s11 + $0xb8] sm:$0xff] %v3002_v0  ;;  %v2994_v12 = vadd.f32 %v5377_v36, %v2993_v16 }
 0x3ca   : > { %v3926_v1 = vpop.f32.mrf.mxu1 }
 0x3cb   : > { %3058 = vst [vmem:[%s5380_s11 + $0xa8] sm:$0xff] %v2994_v12  ;;  %v3015_v43 = vadd.f32 %v3926_v1, %v5377_v36 }
 0x3cc   : > { %v3006_v27 = vpop.f32.mrf.mxu1 }
 0x3cd   : > { %3063 = vst [vmem:[%s5380_s11 + $0xd0] sm:$0xff] %v3015_v43  ;;  %v3007_v58 = vadd.f32 %v5377_v36, %v3006_v27 }
 0x3ce   : > { %v3927_v19 = vpop.f32.mrf.mxu1 }
 0x3cf   : > { %3061 = vst [vmem:[%s5380_s11 + $0xc0] sm:$0xff] %v3007_v58  ;;  %v3018_v35 = vadd.f32 %v3927_v19, %v5377_v36 }
 0x3d0   : > { %v3009_v46 = vpop.f32.mrf.mxu1 }
 0x3d1   : > { %3064 = vst [vmem:[%s5380_s11 + $0xd8] sm:$0xff] %v3018_v35  ;;  %v3010_v21 = vadd.f32 %v5377_v36, %v3009_v46 }
 0x3d2   : > { %v3930_v8 = vpop.f32.mrf.mxu1 }
 0x3d3   : > { %3062 = vst [vmem:[%s5380_s11 + $0xc8] sm:$0xff] %v3010_v21  ;;  %v3031_v38 = vadd.f32 %v3930_v8, %v5377_v36 }
 0x3d4   : > { %v3022_v31 = vpop.f32.mrf.mxu1 }
 0x3d5   : > { %3067 = vst [vmem:[%s5380_s11 + $0xf0] sm:$0xff] %v3031_v38  ;;  %v3023_v7 = vadd.f32 %v5377_v36, %v3022_v31 }
 0x3d6   : > { %v3931_v28 = vpop.f32.mrf.mxu1 }
 0x3d7   : > { %3065 = vst [vmem:[%s5380_s11 + $0xe0] sm:$0xff] %v3023_v7  ;;  %v3034_v18 = vadd.f32 %v3931_v28, %v5377_v36 }
 0x3d8   : > { %v3025_v44 = vpop.f32.mrf.mxu1 }
 0x3d9   : > { %3068 = vst [vmem:[%s5380_s11 + $0xf8] sm:$0xff] %v3034_v18  ;;  %v3026_v23 = vadd.f32 %v5377_v36, %v3025_v44 }
 0x3db   : > { %3066 = vst [vmem:[%s5380_s11 + $0xe8] sm:$0xff] %v3026_v23 }
 0x3dc   : > { %4431 = shalt.err (!%p4428_p3)
}
 0x3dd   : > { %s4432_s6 = scalar_lea.hbm %s5447_s30, 4096  ;;  %s4436_s0 = scalar_lea.hbm %s5652_s14, 8192 }
 0x3de   : > { %p4433_p0 = scmp.ne.s32.totalorder %s5447_s30, %s4432_s6  ;;  %p4437_p7 = scmp.lt.s32.totalorder %s5447_s30, %s5652_s14 }
 0x3df   : > { %p4438_p9 = scmp.lt.s32.totalorder %s4436_s0, %s4432_s6 }
 0x3e0   : > { %p4434_p8 = pnand %p4433_p0, %p4697_p12 }
 0x3e1   : > { %p4439_p10 = por %p4438_p9, %p4437_p7 }
 0x3e2   : > { %p4435_p4 = pneg %p4434_p8 }
 0x3e4   : > { %p4440_p11 = pnand %p4439_p10, %p4435_p4 }
 0x3e6   : > { %4443 = shalt.err (!%p4440_p11)
}
 0x3e7   : > { %s4532_s11 = smov 128   ;;  %s4533_s29 = smov 8  }
 0x3e8   : > { %3956 = dma.vmem_to_hbm [thread:$0]  (%p4697_p12), %s5449_s28, 4096, %s5447_s30, %s3070_s12, %s4532_s11, %s4532_s11, %s4533_s29  }
 0x3e9 PF: > { %s5653_s21 = sld [smem:[#allocation23_spill]]  ;;  %p5654_p1 = scmp.ne.s32.totalorder %s5567_s19, 0 }
 0x3ea   : > { %p5655_p5 = scmp.ge.s32.totalorder %s4518_s26, 2 }
 0x3ec   : > { %p3982_p2 = pnand %p5655_p5, %p5654_p1 }
 0x3ee   : > { %p3983_p13 = pneg %p3982_p2 }
 0x3ef   : > { %s3098_s18 = sand.u32 1, %s5653_s21  }
 0x3f0   : > { %s3099_s27 = scalar_lea.sflag [#allocation5], %s3098_s18 }
 0x3f1   : > { %4493 = dma.done.wait (%p3983_p13), %s3099_s27, 4096  }
 0x3f2   : > { %4495 = vsyncadd (%p3983_p13), %s3099_s27, 4294963200  ;;  %s31_s26 = sadd.s32 1, %s4518_s26   ;;  %s5656_s23 = sld [smem:[#allocation24_spill]] }
 0x3f3   : > { %p28_p6 = scmp.ge.s32.totalorder %s31_s26, 4   ;;  %s5657_s17 = sld [smem:[#allocation27_spill]] }
 0x3f4   : > { %s5658_s9 = sld [smem:[#allocation26_spill]]  ;;  %s5659_s21 = smov %s4502_s22 }
 0x3f5   : > { %s5662_s24 = smov %s4514_s25 }
 0x3f6   :  { %30 = sbr.rel (!%p28_p6) target bundleno = 17 (0x11), region = 153 }
 0x3f8   : > { %s5660_s22 = smov %s5656_s23 }
 0x3f9   : > { %s5661_s23 = smov %s5657_s17 }
 0x3fa   : > { %s5663_s25 = smov %s5658_s9 }
 0x3fb   :  { %3104 = vsyncpa [#allocation4], 1 }
 0x3fc   :  { %3106 = vsyncpa [#allocation4 + $0x1], 1 }
 0x3fd   :  { %3107 = vsyncpa [#allocation7], 1 }
 0x3fe   :  { %3108 = vsyncpa [#allocation11], 1 }
 0x3ff   :  { %3109 = vsyncpa [#allocation14], 1 }
 0x400   :  { %3110 = vsyncpa [#allocation5], 1 }
 0x401   :  { %3112 = vsyncpa [#allocation5 + $0x1], 1 }

</bundles_post_ra>
